<compile_context>
chip_gen: v6e
topology: v6e:2x2x1
jax: 0.10.0
libtpu: 0.0.40
codegen_flags: <defaults>
</compile_context>

<pallas_src>
import functools

import jax
import jax.numpy as jnp
from jax.experimental import pallas as pl
from jax.experimental.pallas import tpu as pltpu

EPS = 1e-5


def _layernorm(x, gamma, beta):
    # x: (R, D) f32, gamma/beta: (1, D) f32
    mean = jnp.mean(x, axis=-1, keepdims=True)
    var = jnp.mean((x - mean) ** 2, axis=-1, keepdims=True)
    return (x - mean) * jax.lax.rsqrt(var + EPS) * gamma + beta


def _residual_block_kernel(
    x_ref,                      # (Bt, S, D)  f32
    ln1_g_ref, ln1_b_ref,       # (1, D)      f32
    wqkv_ref, bqkv_ref,         # (D, 3D) bf16, (1, 3D) f32   (q-scale pre-folded)
    wo_ref, bo_ref,             # (D, D)  bf16, (1, D)  f32
    ln2_g_ref, ln2_b_ref,       # (1, D)      f32
    wfc_ref, bfc_ref,           # (D, 4D) bf16, (1, 4D) f32
    wpr_ref, bpr_ref,           # (4D, D) bf16, (1, D)  f32
    o_ref,                      # (Bt, S, D)  f32
    ctx_ref,                    # (Bt, S, D)  f32  VMEM scratch: head outputs, no concat
    *, n_head: int, mlp_chunks: int,
):
    Bt, S, D = x_ref.shape
    hd = D // n_head
    R = Bt * S
    bf16 = jnp.bfloat16
    f32 = jnp.float32

    x = x_ref[...].reshape(R, D)                              # batch-major rows (f32)

    # ---- ln_1 (f32) + packed QKV projection (bf16 MXU operands, f32 accumulation) ----
    h = _layernorm(x, ln1_g_ref[...], ln1_b_ref[...])
    qkv = jnp.dot(h.astype(bf16), wqkv_ref[...],
                  preferred_element_type=f32) + bqkv_ref[...]
    q = qkv[:, 0 * D:1 * D].reshape(Bt, S, D)                 # q pre-scaled by 1/sqrt(hd)
    k = qkv[:, 1 * D:2 * D].reshape(Bt, S, D)
    v = qkv[:, 2 * D:3 * D].reshape(Bt, S, D)

    # ---- attention: per head, one batched-over-Bt einsum pair; softmax in f32.
    #      Head contexts go straight into the VMEM scratch slab (no concatenates). ----
    for hh in range(n_head):
        cols = slice(hh * hd, (hh + 1) * hd)
        qh = q[:, :, cols].astype(bf16)                       # (Bt, S, hd)
        kh = k[:, :, cols].astype(bf16)
        vh = v[:, :, cols].astype(bf16)
        scores = jnp.einsum("bqd,bkd->bqk", qh, kh,
                            preferred_element_type=f32)       # (Bt, S, S) f32
        m = jnp.max(scores, axis=-1, keepdims=True)
        p = jnp.exp(scores - m)
        p = p * pl.reciprocal(jnp.sum(p, axis=-1, keepdims=True), approx=True)
        ctx_ref[:, :, cols] = jnp.einsum("bqk,bkd->bqd", p.astype(bf16), vh,
                                         preferred_element_type=f32)   # (Bt, S, hd)

    # ---- single full-width out_proj + residual 1 ----
    ctx = ctx_ref[...].reshape(R, D).astype(bf16)
    attn = jnp.dot(ctx, wo_ref[...], preferred_element_type=f32) + bo_ref[...]
    x1 = x + attn

    # ---- ln_2 + MLP (c_fc -> QuickGELU -> c_proj), chunked over the 4D hidden dim ----
    h2 = _layernorm(x1, ln2_g_ref[...], ln2_b_ref[...]).astype(bf16)
    hidden = wfc_ref.shape[1]
    chunk = hidden // mlp_chunks
    proj = jnp.zeros((R, D), f32)
    for c in range(mlp_chunks):
        sl = slice(c * chunk, (c + 1) * chunk)
        fc = jnp.dot(h2, wfc_ref[:, sl], preferred_element_type=f32) + bfc_ref[:, sl]
        g = fc * jax.nn.sigmoid(1.702 * fc)    # QuickGELU; f32 (v5e has no bf16 VPU/EUP)
        proj = proj + jnp.dot(g.astype(bf16), wpr_ref[sl, :], preferred_element_type=f32)
    proj = proj + bpr_ref[...]

    o_ref[...] = (x1 + proj).reshape(Bt, S, D)                # residual 2


def _vmem_capacity_bytes(default=64 << 20):
    try:
        return int(pltpu.get_tpu_info().vmem_capacity_bytes)
    except Exception:
        return int(default)


def _pick_batch_tile(B, S, target_rows=512, max_rows=4096):
    """Divisor Bt of B: smallest with Bt*S >= target_rows (else largest fitting),
    preferring an even grid length so both v7x TensorCores stay busy."""
    divisors = [bt for bt in range(1, B + 1) if B % bt == 0 and bt * S <= max_rows]
    if not divisors:
        return 1
    good = [bt for bt in divisors if bt * S >= target_rows]
    pool = good or divisors
    even = [bt for bt in pool if (B // bt) % 2 == 0]
    if good:
        return min(even) if even else min(pool)
    return max(even) if even else max(pool)


def residual_attention_block(x_sbd, params, n_head, *, mlp_chunks=4):
    """x_sbd: (S, B, D) float32, matching PyTorch's (L, N, E). Returns (S, B, D) float32."""
    S, B, D = x_sbd.shape
    hd = D // n_head
    scale = hd ** -0.5
    hidden = 4 * D
    if hidden % mlp_chunks:
        mlp_chunks = 1

    # Activations enter the kernel batch-major (two HBM-side transposes, kept on purpose;
    # see header comment).
    x_bsd = jnp.transpose(x_sbd, (1, 0, 2)).astype(jnp.float32)       # (B, S, D)

    # Fold the 1/sqrt(hd) query scale into the q columns of the packed QKV projection.
    col_scale = jnp.concatenate(
        [jnp.full((D,), scale, jnp.float32), jnp.ones((2 * D,), jnp.float32)])
    wqkv_t = (params["in_proj_w"].astype(jnp.float32).T
              * col_scale[None, :]).astype(jnp.bfloat16)              # (D, 3D) bf16
    bqkv = (params["in_proj_b"].astype(jnp.float32) * col_scale).reshape(1, -1)  # f32

    wo_t = params["out_proj_w"].astype(jnp.float32).T.astype(jnp.bfloat16)   # (D, D)
    wfc_t = params["c_fc_w"].astype(jnp.float32).T.astype(jnp.bfloat16)      # (D, 4D)
    wpr_t = params["c_proj_w"].astype(jnp.float32).T.astype(jnp.bfloat16)    # (4D, D)

    row = lambda v: v.astype(jnp.float32).reshape(1, -1)
    param_ops = (
        row(params["ln1_g"]), row(params["ln1_b"]),
        wqkv_t, bqkv,
        wo_t, row(params["out_proj_b"]),
        row(params["ln2_g"]), row(params["ln2_b"]),
        wfc_t, row(params["c_fc_b"]),
        wpr_t, row(params["c_proj_b"]),
    )

    # ---- batch tile & VMEM budget (single-buffered weights, double-buffered x/o blocks) ----
    param_bytes = sum(int(a.size) * a.dtype.itemsize for a in param_ops)
    phys_vmem = _vmem_capacity_bytes()
    chunk = hidden // mlp_chunks
    bytes_per_row = 4 * (18 * D + 3 * S + 3 * chunk)   # rough f32 live bytes per row
    act_budget = max(2 << 20, phys_vmem - (24 << 20) - param_bytes)
    max_rows = int(max(S, min(4096, act_budget // max(1, bytes_per_row))))
    Bt = _pick_batch_tile(B, S, target_rows=min(512, max_rows), max_rows=max_rows)
    rows = Bt * S
    vmem_limit = int(max(32 << 20,
                         min(phys_vmem - (16 << 20),
                             param_bytes + rows * bytes_per_row + (8 << 20))))

    x_spec = pl.BlockSpec((Bt, S, D), lambda b: (b, 0, 0))
    out_spec = pl.BlockSpec((Bt, S, D), lambda b: (b, 0, 0))
    # Weights / biases / LN params: whole-array VMEM residents (copied once, no
    # per-grid-step re-DMA, no double-buffering).
    vmem_resident = pl.BlockSpec(memory_space=pltpu.MemorySpace.VMEM)
    in_specs = [x_spec] + [vmem_resident] * len(param_ops)

    out_bsd = pl.pallas_call(
        functools.partial(_residual_block_kernel, n_head=n_head, mlp_chunks=mlp_chunks),
        out_shape=jax.ShapeDtypeStruct((B, S, D), jnp.float32),
        grid=(B // Bt,),
        in_specs=in_specs,
        out_specs=out_spec,
        scratch_shapes=[pltpu.VMEM((Bt, S, D), jnp.float32)],
        compiler_params=pltpu.CompilerParams(
            dimension_semantics=("parallel",),
            vmem_limit_bytes=vmem_limit,
        ),
    )(x_bsd, *param_ops)

    return jnp.transpose(out_bsd, (1, 0, 2))                          # back to (S, B, D)


# ----------------------- pure-JAX f32 reference (for verification) -----------------------
def reference_forward(x, p, n_head):
    S, B, D = x.shape
    hd = D // n_head

    def ln(z, g, b):
        m = z.mean(-1, keepdims=True)
        v = ((z - m) ** 2).mean(-1, keepdims=True)
        return (z - m) / jnp.sqrt(v + EPS) * g + b

    h = ln(x, p["ln1_g"], p["ln1_b"])
    qkv = h @ p["in_proj_w"].T + p["in_proj_b"]
    q, k, v = qkv[..., :D], qkv[..., D:2 * D], qkv[..., 2 * D:]
    q = q * (hd ** -0.5)
    q = q.reshape(S, B, n_head, hd)
    k = k.reshape(S, B, n_head, hd)
    v = v.reshape(S, B, n_head, hd)
    s = jnp.einsum("sbhd,tbhd->bhst", q, k)
    a = jax.nn.softmax(s, axis=-1)
    ctx = jnp.einsum("bhst,tbhd->sbhd", a, v).reshape(S, B, D)
    attn_out = ctx @ p["out_proj_w"].T + p["out_proj_b"]
    x1 = x + attn_out
    h2 = ln(x1, p["ln2_g"], p["ln2_b"])
    fc = h2 @ p["c_fc_w"].T + p["c_fc_b"]
    g = fc * jax.nn.sigmoid(1.702 * fc)
    return x1 + g @ p["c_proj_w"].T + p["c_proj_b"]


def init_params(key, d_model):
    ks = jax.random.split(key, 8)
    std = 0.02
    return {
        "ln1_g": jnp.ones((d_model,), jnp.float32),
        "ln1_b": jnp.zeros((d_model,), jnp.float32),
        "in_proj_w": std * jax.random.normal(ks[0], (3 * d_model, d_model), jnp.float32),
        "in_proj_b": std * jax.random.normal(ks[1], (3 * d_model,), jnp.float32),
        "out_proj_w": std * jax.random.normal(ks[2], (d_model, d_model), jnp.float32),
        "out_proj_b": std * jax.random.normal(ks[3], (d_model,), jnp.float32),
        "ln2_g": jnp.ones((d_model,), jnp.float32),
        "ln2_b": jnp.zeros((d_model,), jnp.float32),
        "c_fc_w": std * jax.random.normal(ks[4], (4 * d_model, d_model), jnp.float32),
        "c_fc_b": std * jax.random.normal(ks[5], (4 * d_model,), jnp.float32),
        "c_proj_w": std * jax.random.normal(ks[6], (d_model, 4 * d_model), jnp.float32),
        "c_proj_b": std * jax.random.normal(ks[7], (d_model,), jnp.float32),
    }


if __name__ == "__main__":
    # small shapes consistent with the module: seq=8, batch=2, d_model=32, n_head=4
    S, B, D, H = 8, 2, 32, 4
    key = jax.random.PRNGKey(0)
    kx, kp = jax.random.split(key)
    x = jax.random.normal(kx, (S, B, D), jnp.float32)   # PyTorch layout (L, N, E)
    params = init_params(kp, D)

    out = residual_attention_block(x, params, n_head=H)
    out = jax.block_until_ready(out)

    ref = reference_forward(x, params, H)
    assert out.shape == (S, B, D)
    max_err = float(jnp.max(jnp.abs(out - ref)))
    # bf16 matmuls + approx reciprocal -> slightly looser tolerance than pure f32
    assert jnp.allclose(out, ref, rtol=2e-2, atol=2e-2), f"mismatch vs reference (max abs err={max_err})"

    print("KERNEL_OK")
</pallas_src>

<mosaic_0001>
module attributes {stable_mosaic.version = 11 : i64} {
  func.func @_residual_block_kernel(%arg0: i32, %arg1: memref<1x8x32xf32, #tpu.memory_space<vmem>>, %arg2: memref<1x32xf32, #tpu.memory_space<vmem>>, %arg3: memref<1x32xf32, #tpu.memory_space<vmem>>, %arg4: memref<32x96xbf16, #tpu.memory_space<vmem>>, %arg5: memref<1x96xf32, #tpu.memory_space<vmem>>, %arg6: memref<32x32xbf16, #tpu.memory_space<vmem>>, %arg7: memref<1x32xf32, #tpu.memory_space<vmem>>, %arg8: memref<1x32xf32, #tpu.memory_space<vmem>>, %arg9: memref<1x32xf32, #tpu.memory_space<vmem>>, %arg10: memref<32x128xbf16, #tpu.memory_space<vmem>>, %arg11: memref<1x128xf32, #tpu.memory_space<vmem>>, %arg12: memref<128x32xbf16, #tpu.memory_space<vmem>>, %arg13: memref<1x32xf32, #tpu.memory_space<vmem>>, %arg14: memref<1x8x32xf32, #tpu.memory_space<vmem>>, %arg15: memref<1x8x32xf32, #tpu.memory_space<vmem>>) attributes {dimension_semantics = [#tpu.dimension_semantics<parallel>], iteration_bounds = array<i64: 2>, scalar_prefetch = 0 : i64, scratch_operands = 1 : i64, tpu.core_type = #tpu.core_type<tc>, window_params = [{transform_indices = @transform_0, window_bounds = array<i64: 1, 8, 32>}, {pipeline_mode = #tpu.pipeline_mode<synchronous>, transform_indices = @transform_1, window_bounds = array<i64: 1, 32>}, {pipeline_mode = #tpu.pipeline_mode<synchronous>, transform_indices = @transform_2, window_bounds = array<i64: 1, 32>}, {pipeline_mode = #tpu.pipeline_mode<synchronous>, transform_indices = @transform_3, window_bounds = array<i64: 32, 96>}, {pipeline_mode = #tpu.pipeline_mode<synchronous>, transform_indices = @transform_4, window_bounds = array<i64: 1, 96>}, {pipeline_mode = #tpu.pipeline_mode<synchronous>, transform_indices = @transform_5, window_bounds = array<i64: 32, 32>}, {pipeline_mode = #tpu.pipeline_mode<synchronous>, transform_indices = @transform_6, window_bounds = array<i64: 1, 32>}, {pipeline_mode = #tpu.pipeline_mode<synchronous>, transform_indices = @transform_7, window_bounds = array<i64: 1, 32>}, {pipeline_mode = #tpu.pipeline_mode<synchronous>, transform_indices = @transform_8, window_bounds = array<i64: 1, 32>}, {pipeline_mode = #tpu.pipeline_mode<synchronous>, transform_indices = @transform_9, window_bounds = array<i64: 32, 128>}, {pipeline_mode = #tpu.pipeline_mode<synchronous>, transform_indices = @transform_10, window_bounds = array<i64: 1, 128>}, {pipeline_mode = #tpu.pipeline_mode<synchronous>, transform_indices = @transform_11, window_bounds = array<i64: 128, 32>}, {pipeline_mode = #tpu.pipeline_mode<synchronous>, transform_indices = @transform_12, window_bounds = array<i64: 1, 32>}, {transform_indices = @transform_13, window_bounds = array<i64: 1, 8, 32>}]} {
    %c0 = arith.constant 0 : index
    %c0_0 = arith.constant 0 : index
    %c0_1 = arith.constant 0 : index
    %0 = vector.load %arg1[%c0, %c0_0, %c0_1] : memref<1x8x32xf32, #tpu.memory_space<vmem>>, vector<1x8x32xf32>
    %1 = vector.shape_cast %0 : vector<1x8x32xf32> to vector<8x32xf32>
    %c0_2 = arith.constant 0 : index
    %c0_3 = arith.constant 0 : index
    %2 = vector.load %arg2[%c0_2, %c0_3] : memref<1x32xf32, #tpu.memory_space<vmem>>, vector<1x32xf32>
    %c0_4 = arith.constant 0 : index
    %c0_5 = arith.constant 0 : index
    %3 = vector.load %arg3[%c0_4, %c0_5] : memref<1x32xf32, #tpu.memory_space<vmem>>, vector<1x32xf32>
    %cst = arith.constant dense<0.000000e+00> : vector<8xf32>
    %4 = vector.multi_reduction <add>, %1, %cst [1] : vector<8x32xf32> to vector<8xf32>
    %5 = vector.shape_cast %4 : vector<8xf32> to vector<8x1xf32>
    %cst_6 = arith.constant 3.200000e+01 : f32
    %6 = vector.broadcast %cst_6 : f32 to vector<8x1xf32>
    %7 = arith.divf %5, %6 : vector<8x1xf32>
    %8 = vector.broadcast %7 : vector<8x1xf32> to vector<8x32xf32>
    %9 = arith.subf %1, %8 : vector<8x32xf32>
    %10 = arith.mulf %9, %9 : vector<8x32xf32>
    %cst_7 = arith.constant dense<0.000000e+00> : vector<8xf32>
    %11 = vector.multi_reduction <add>, %10, %cst_7 [1] : vector<8x32xf32> to vector<8xf32>
    %12 = vector.shape_cast %11 : vector<8xf32> to vector<8x1xf32>
    %cst_8 = arith.constant 3.200000e+01 : f32
    %13 = vector.broadcast %cst_8 : f32 to vector<8x1xf32>
    %14 = arith.divf %12, %13 : vector<8x1xf32>
    %15 = vector.broadcast %7 : vector<8x1xf32> to vector<8x32xf32>
    %16 = arith.subf %1, %15 : vector<8x32xf32>
    %cst_9 = arith.constant 9.99999974E-6 : f32
    %17 = vector.broadcast %cst_9 : f32 to vector<8x1xf32>
    %18 = arith.addf %14, %17 : vector<8x1xf32>
    %19 = math.rsqrt %18 : vector<8x1xf32>
    %20 = vector.broadcast %19 : vector<8x1xf32> to vector<8x32xf32>
    %21 = arith.mulf %16, %20 : vector<8x32xf32>
    %22 = vector.broadcast %2 : vector<1x32xf32> to vector<8x32xf32>
    %23 = arith.mulf %21, %22 : vector<8x32xf32>
    %24 = vector.broadcast %3 : vector<1x32xf32> to vector<8x32xf32>
    %25 = arith.addf %23, %24 : vector<8x32xf32>
    %26 = arith.truncf %25 : vector<8x32xf32> to vector<8x32xbf16>
    %c0_10 = arith.constant 0 : index
    %c0_11 = arith.constant 0 : index
    %27 = vector.load %arg4[%c0_10, %c0_11] : memref<32x96xbf16, #tpu.memory_space<vmem>>, vector<32x96xbf16>
    %cst_12 = arith.constant dense<0.000000e+00> : vector<8x96xf32>
    %28 = tpu.matmul %26, %27, %cst_12 {dimension_numbers = #tpu.dot_dimension_numbers<[1], [0], [0], [1], [0, 0, 1, 1], [], []>} : vector<8x32xbf16>, vector<32x96xbf16>, vector<8x96xf32> -> vector<8x96xf32>
    %c0_13 = arith.constant 0 : index
    %c0_14 = arith.constant 0 : index
    %29 = vector.load %arg5[%c0_13, %c0_14] : memref<1x96xf32, #tpu.memory_space<vmem>>, vector<1x96xf32>
    %30 = vector.broadcast %29 : vector<1x96xf32> to vector<8x96xf32>
    %31 = arith.addf %28, %30 : vector<8x96xf32>
    %32 = vector.extract_strided_slice %31 {offsets = [0, 0], sizes = [8, 32], strides = [1, 1]} : vector<8x96xf32> to vector<8x32xf32>
    %33 = vector.shape_cast %32 : vector<8x32xf32> to vector<1x8x32xf32>
    %34 = vector.extract_strided_slice %31 {offsets = [0, 32], sizes = [8, 32], strides = [1, 1]} : vector<8x96xf32> to vector<8x32xf32>
    %35 = vector.shape_cast %34 : vector<8x32xf32> to vector<1x8x32xf32>
    %36 = vector.extract_strided_slice %31 {offsets = [0, 64], sizes = [8, 32], strides = [1, 1]} : vector<8x96xf32> to vector<8x32xf32>
    %37 = vector.shape_cast %36 : vector<8x32xf32> to vector<1x8x32xf32>
    %38 = vector.extract_strided_slice %33 {offsets = [0, 0, 0], sizes = [1, 8, 8], strides = [1, 1, 1]} : vector<1x8x32xf32> to vector<1x8x8xf32>
    %39 = arith.truncf %38 : vector<1x8x8xf32> to vector<1x8x8xbf16>
    %40 = vector.extract_strided_slice %35 {offsets = [0, 0, 0], sizes = [1, 8, 8], strides = [1, 1, 1]} : vector<1x8x32xf32> to vector<1x8x8xf32>
    %41 = arith.truncf %40 : vector<1x8x8xf32> to vector<1x8x8xbf16>
    %42 = vector.extract_strided_slice %37 {offsets = [0, 0, 0], sizes = [1, 8, 8], strides = [1, 1, 1]} : vector<1x8x32xf32> to vector<1x8x8xf32>
    %43 = arith.truncf %42 : vector<1x8x8xf32> to vector<1x8x8xbf16>
    "tpu.trace_start"() <{level = 10 : i32, message = "bqd,bkd->bqk"}> : () -> ()
    %cst_15 = arith.constant dense<0.000000e+00> : vector<1x8x8xf32>
    %44 = tpu.matmul %39, %41, %cst_15 {dimension_numbers = #tpu.dot_dimension_numbers<[2], [2], [1], [1], [0, 0, 0, 1, 1, 1], [0], [0]>} : vector<1x8x8xbf16>, vector<1x8x8xbf16>, vector<1x8x8xf32> -> vector<1x8x8xf32>
    "tpu.trace_stop"() : () -> ()
    %cst_16 = arith.constant dense<0xFF800000> : vector<1x8xf32>
    %45 = vector.multi_reduction <maximumf>, %44, %cst_16 [2] : vector<1x8x8xf32> to vector<1x8xf32>
    %46 = vector.shape_cast %45 : vector<1x8xf32> to vector<1x8x1xf32>
    %47 = vector.broadcast %46 : vector<1x8x1xf32> to vector<1x8x8xf32>
    %48 = arith.subf %44, %47 : vector<1x8x8xf32>
    %49 = math.exp %48 : vector<1x8x8xf32>
    %cst_17 = arith.constant dense<0.000000e+00> : vector<1x8xf32>
    %50 = vector.multi_reduction <add>, %49, %cst_17 [2] : vector<1x8x8xf32> to vector<1x8xf32>
    %51 = vector.shape_cast %50 : vector<1x8xf32> to vector<1x8x1xf32>
    %52 = tpu.reciprocal %51 {approx = true} : vector<1x8x1xf32> -> vector<1x8x1xf32>
    %53 = vector.broadcast %52 : vector<1x8x1xf32> to vector<1x8x8xf32>
    %54 = arith.mulf %49, %53 : vector<1x8x8xf32>
    %55 = arith.truncf %54 : vector<1x8x8xf32> to vector<1x8x8xbf16>
    "tpu.trace_start"() <{level = 10 : i32, message = "bqk,bkd->bqd"}> : () -> ()
    %cst_18 = arith.constant dense<0.000000e+00> : vector<1x8x8xf32>
    %56 = tpu.matmul %55, %43, %cst_18 {dimension_numbers = #tpu.dot_dimension_numbers<[2], [1], [1], [2], [0, 0, 0, 1, 1, 2], [0], [0]>} : vector<1x8x8xbf16>, vector<1x8x8xbf16>, vector<1x8x8xf32> -> vector<1x8x8xf32>
    "tpu.trace_stop"() : () -> ()
    %c0_19 = arith.constant 0 : index
    %c0_20 = arith.constant 0 : index
    %c0_21 = arith.constant 0 : index
    %57 = vector.load %arg15[%c0_19, %c0_20, %c0_21] : memref<1x8x32xf32, #tpu.memory_space<vmem>>, vector<1x8x8xf32>
    tpu.vector_store %arg15[%c0_19, %c0_20, %c0_21], %56 {strides = array<i32>} : memref<1x8x32xf32, #tpu.memory_space<vmem>>, vector<1x8x8xf32>,
    %58 = vector.extract_strided_slice %33 {offsets = [0, 0, 8], sizes = [1, 8, 8], strides = [1, 1, 1]} : vector<1x8x32xf32> to vector<1x8x8xf32>
    %59 = arith.truncf %58 : vector<1x8x8xf32> to vector<1x8x8xbf16>
    %60 = vector.extract_strided_slice %35 {offsets = [0, 0, 8], sizes = [1, 8, 8], strides = [1, 1, 1]} : vector<1x8x32xf32> to vector<1x8x8xf32>
    %61 = arith.truncf %60 : vector<1x8x8xf32> to vector<1x8x8xbf16>
    %62 = vector.extract_strided_slice %37 {offsets = [0, 0, 8], sizes = [1, 8, 8], strides = [1, 1, 1]} : vector<1x8x32xf32> to vector<1x8x8xf32>
    %63 = arith.truncf %62 : vector<1x8x8xf32> to vector<1x8x8xbf16>
    "tpu.trace_start"() <{level = 10 : i32, message = "bqd,bkd->bqk"}> : () -> ()
    %cst_22 = arith.constant dense<0.000000e+00> : vector<1x8x8xf32>
    %64 = tpu.matmul %59, %61, %cst_22 {dimension_numbers = #tpu.dot_dimension_numbers<[2], [2], [1], [1], [0, 0, 0, 1, 1, 1], [0], [0]>} : vector<1x8x8xbf16>, vector<1x8x8xbf16>, vector<1x8x8xf32> -> vector<1x8x8xf32>
    "tpu.trace_stop"() : () -> ()
    %cst_23 = arith.constant dense<0xFF800000> : vector<1x8xf32>
    %65 = vector.multi_reduction <maximumf>, %64, %cst_23 [2] : vector<1x8x8xf32> to vector<1x8xf32>
    %66 = vector.shape_cast %65 : vector<1x8xf32> to vector<1x8x1xf32>
    %67 = vector.broadcast %66 : vector<1x8x1xf32> to vector<1x8x8xf32>
    %68 = arith.subf %64, %67 : vector<1x8x8xf32>
    %69 = math.exp %68 : vector<1x8x8xf32>
    %cst_24 = arith.constant dense<0.000000e+00> : vector<1x8xf32>
    %70 = vector.multi_reduction <add>, %69, %cst_24 [2] : vector<1x8x8xf32> to vector<1x8xf32>
    %71 = vector.shape_cast %70 : vector<1x8xf32> to vector<1x8x1xf32>
    %72 = tpu.reciprocal %71 {approx = true} : vector<1x8x1xf32> -> vector<1x8x1xf32>
    %73 = vector.broadcast %72 : vector<1x8x1xf32> to vector<1x8x8xf32>
    %74 = arith.mulf %69, %73 : vector<1x8x8xf32>
    %75 = arith.truncf %74 : vector<1x8x8xf32> to vector<1x8x8xbf16>
    "tpu.trace_start"() <{level = 10 : i32, message = "bqk,bkd->bqd"}> : () -> ()
    %cst_25 = arith.constant dense<0.000000e+00> : vector<1x8x8xf32>
    %76 = tpu.matmul %75, %63, %cst_25 {dimension_numbers = #tpu.dot_dimension_numbers<[2], [1], [1], [2], [0, 0, 0, 1, 1, 2], [0], [0]>} : vector<1x8x8xbf16>, vector<1x8x8xbf16>, vector<1x8x8xf32> -> vector<1x8x8xf32>
    "tpu.trace_stop"() : () -> ()
    %c0_26 = arith.constant 0 : index
    %c0_27 = arith.constant 0 : index
    %c8 = arith.constant 8 : index
    %77 = vector.load %arg15[%c0_26, %c0_27, %c8] : memref<1x8x32xf32, #tpu.memory_space<vmem>>, vector<1x8x8xf32>
    tpu.vector_store %arg15[%c0_26, %c0_27, %c8], %76 {strides = array<i32>} : memref<1x8x32xf32, #tpu.memory_space<vmem>>, vector<1x8x8xf32>,
    %78 = vector.extract_strided_slice %33 {offsets = [0, 0, 16], sizes = [1, 8, 8], strides = [1, 1, 1]} : vector<1x8x32xf32> to vector<1x8x8xf32>
    %79 = arith.truncf %78 : vector<1x8x8xf32> to vector<1x8x8xbf16>
    %80 = vector.extract_strided_slice %35 {offsets = [0, 0, 16], sizes = [1, 8, 8], strides = [1, 1, 1]} : vector<1x8x32xf32> to vector<1x8x8xf32>
    %81 = arith.truncf %80 : vector<1x8x8xf32> to vector<1x8x8xbf16>
    %82 = vector.extract_strided_slice %37 {offsets = [0, 0, 16], sizes = [1, 8, 8], strides = [1, 1, 1]} : vector<1x8x32xf32> to vector<1x8x8xf32>
    %83 = arith.truncf %82 : vector<1x8x8xf32> to vector<1x8x8xbf16>
    "tpu.trace_start"() <{level = 10 : i32, message = "bqd,bkd->bqk"}> : () -> ()
    %cst_28 = arith.constant dense<0.000000e+00> : vector<1x8x8xf32>
    %84 = tpu.matmul %79, %81, %cst_28 {dimension_numbers = #tpu.dot_dimension_numbers<[2], [2], [1], [1], [0, 0, 0, 1, 1, 1], [0], [0]>} : vector<1x8x8xbf16>, vector<1x8x8xbf16>, vector<1x8x8xf32> -> vector<1x8x8xf32>
    "tpu.trace_stop"() : () -> ()
    %cst_29 = arith.constant dense<0xFF800000> : vector<1x8xf32>
    %85 = vector.multi_reduction <maximumf>, %84, %cst_29 [2] : vector<1x8x8xf32> to vector<1x8xf32>
    %86 = vector.shape_cast %85 : vector<1x8xf32> to vector<1x8x1xf32>
    %87 = vector.broadcast %86 : vector<1x8x1xf32> to vector<1x8x8xf32>
    %88 = arith.subf %84, %87 : vector<1x8x8xf32>
    %89 = math.exp %88 : vector<1x8x8xf32>
    %cst_30 = arith.constant dense<0.000000e+00> : vector<1x8xf32>
    %90 = vector.multi_reduction <add>, %89, %cst_30 [2] : vector<1x8x8xf32> to vector<1x8xf32>
    %91 = vector.shape_cast %90 : vector<1x8xf32> to vector<1x8x1xf32>
    %92 = tpu.reciprocal %91 {approx = true} : vector<1x8x1xf32> -> vector<1x8x1xf32>
    %93 = vector.broadcast %92 : vector<1x8x1xf32> to vector<1x8x8xf32>
    %94 = arith.mulf %89, %93 : vector<1x8x8xf32>
    %95 = arith.truncf %94 : vector<1x8x8xf32> to vector<1x8x8xbf16>
    "tpu.trace_start"() <{level = 10 : i32, message = "bqk,bkd->bqd"}> : () -> ()
    %cst_31 = arith.constant dense<0.000000e+00> : vector<1x8x8xf32>
    %96 = tpu.matmul %95, %83, %cst_31 {dimension_numbers = #tpu.dot_dimension_numbers<[2], [1], [1], [2], [0, 0, 0, 1, 1, 2], [0], [0]>} : vector<1x8x8xbf16>, vector<1x8x8xbf16>, vector<1x8x8xf32> -> vector<1x8x8xf32>
    "tpu.trace_stop"() : () -> ()
    %c0_32 = arith.constant 0 : index
    %c0_33 = arith.constant 0 : index
    %c16 = arith.constant 16 : index
    %97 = vector.load %arg15[%c0_32, %c0_33, %c16] : memref<1x8x32xf32, #tpu.memory_space<vmem>>, vector<1x8x8xf32>
    tpu.vector_store %arg15[%c0_32, %c0_33, %c16], %96 {strides = array<i32>} : memref<1x8x32xf32, #tpu.memory_space<vmem>>, vector<1x8x8xf32>,
    %98 = vector.extract_strided_slice %33 {offsets = [0, 0, 24], sizes = [1, 8, 8], strides = [1, 1, 1]} : vector<1x8x32xf32> to vector<1x8x8xf32>
    %99 = arith.truncf %98 : vector<1x8x8xf32> to vector<1x8x8xbf16>
    %100 = vector.extract_strided_slice %35 {offsets = [0, 0, 24], sizes = [1, 8, 8], strides = [1, 1, 1]} : vector<1x8x32xf32> to vector<1x8x8xf32>
    %101 = arith.truncf %100 : vector<1x8x8xf32> to vector<1x8x8xbf16>
    %102 = vector.extract_strided_slice %37 {offsets = [0, 0, 24], sizes = [1, 8, 8], strides = [1, 1, 1]} : vector<1x8x32xf32> to vector<1x8x8xf32>
    %103 = arith.truncf %102 : vector<1x8x8xf32> to vector<1x8x8xbf16>
    "tpu.trace_start"() <{level = 10 : i32, message = "bqd,bkd->bqk"}> : () -> ()
    %cst_34 = arith.constant dense<0.000000e+00> : vector<1x8x8xf32>
    %104 = tpu.matmul %99, %101, %cst_34 {dimension_numbers = #tpu.dot_dimension_numbers<[2], [2], [1], [1], [0, 0, 0, 1, 1, 1], [0], [0]>} : vector<1x8x8xbf16>, vector<1x8x8xbf16>, vector<1x8x8xf32> -> vector<1x8x8xf32>
    "tpu.trace_stop"() : () -> ()
    %cst_35 = arith.constant dense<0xFF800000> : vector<1x8xf32>
    %105 = vector.multi_reduction <maximumf>, %104, %cst_35 [2] : vector<1x8x8xf32> to vector<1x8xf32>
    %106 = vector.shape_cast %105 : vector<1x8xf32> to vector<1x8x1xf32>
    %107 = vector.broadcast %106 : vector<1x8x1xf32> to vector<1x8x8xf32>
    %108 = arith.subf %104, %107 : vector<1x8x8xf32>
    %109 = math.exp %108 : vector<1x8x8xf32>
    %cst_36 = arith.constant dense<0.000000e+00> : vector<1x8xf32>
    %110 = vector.multi_reduction <add>, %109, %cst_36 [2] : vector<1x8x8xf32> to vector<1x8xf32>
    %111 = vector.shape_cast %110 : vector<1x8xf32> to vector<1x8x1xf32>
    %112 = tpu.reciprocal %111 {approx = true} : vector<1x8x1xf32> -> vector<1x8x1xf32>
    %113 = vector.broadcast %112 : vector<1x8x1xf32> to vector<1x8x8xf32>
    %114 = arith.mulf %109, %113 : vector<1x8x8xf32>
    %115 = arith.truncf %114 : vector<1x8x8xf32> to vector<1x8x8xbf16>
    "tpu.trace_start"() <{level = 10 : i32, message = "bqk,bkd->bqd"}> : () -> ()
    %cst_37 = arith.constant dense<0.000000e+00> : vector<1x8x8xf32>
    %116 = tpu.matmul %115, %103, %cst_37 {dimension_numbers = #tpu.dot_dimension_numbers<[2], [1], [1], [2], [0, 0, 0, 1, 1, 2], [0], [0]>} : vector<1x8x8xbf16>, vector<1x8x8xbf16>, vector<1x8x8xf32> -> vector<1x8x8xf32>
    "tpu.trace_stop"() : () -> ()
    %c0_38 = arith.constant 0 : index
    %c0_39 = arith.constant 0 : index
    %c24 = arith.constant 24 : index
    %117 = vector.load %arg15[%c0_38, %c0_39, %c24] : memref<1x8x32xf32, #tpu.memory_space<vmem>>, vector<1x8x8xf32>
    tpu.vector_store %arg15[%c0_38, %c0_39, %c24], %116 {strides = array<i32>} : memref<1x8x32xf32, #tpu.memory_space<vmem>>, vector<1x8x8xf32>,
    %c0_40 = arith.constant 0 : index
    %c0_41 = arith.constant 0 : index
    %c0_42 = arith.constant 0 : index
    %118 = vector.load %arg15[%c0_40, %c0_41, %c0_42] : memref<1x8x32xf32, #tpu.memory_space<vmem>>, vector<1x8x32xf32>
    %119 = vector.shape_cast %118 : vector<1x8x32xf32> to vector<8x32xf32>
    %120 = arith.truncf %119 : vector<8x32xf32> to vector<8x32xbf16>
    %c0_43 = arith.constant 0 : index
    %c0_44 = arith.constant 0 : index
    %121 = vector.load %arg6[%c0_43, %c0_44] : memref<32x32xbf16, #tpu.memory_space<vmem>>, vector<32x32xbf16>
    %cst_45 = arith.constant dense<0.000000e+00> : vector<8x32xf32>
    %122 = tpu.matmul %120, %121, %cst_45 {dimension_numbers = #tpu.dot_dimension_numbers<[1], [0], [0], [1], [0, 0, 1, 1], [], []>} : vector<8x32xbf16>, vector<32x32xbf16>, vector<8x32xf32> -> vector<8x32xf32>
    %c0_46 = arith.constant 0 : index
    %c0_47 = arith.constant 0 : index
    %123 = vector.load %arg7[%c0_46, %c0_47] : memref<1x32xf32, #tpu.memory_space<vmem>>, vector<1x32xf32>
    %124 = vector.broadcast %123 : vector<1x32xf32> to vector<8x32xf32>
    %125 = arith.addf %122, %124 : vector<8x32xf32>
    %126 = arith.addf %1, %125 : vector<8x32xf32>
    %c0_48 = arith.constant 0 : index
    %c0_49 = arith.constant 0 : index
    %127 = vector.load %arg8[%c0_48, %c0_49] : memref<1x32xf32, #tpu.memory_space<vmem>>, vector<1x32xf32>
    %c0_50 = arith.constant 0 : index
    %c0_51 = arith.constant 0 : index
    %128 = vector.load %arg9[%c0_50, %c0_51] : memref<1x32xf32, #tpu.memory_space<vmem>>, vector<1x32xf32>
    %cst_52 = arith.constant dense<0.000000e+00> : vector<8xf32>
    %129 = vector.multi_reduction <add>, %126, %cst_52 [1] : vector<8x32xf32> to vector<8xf32>
    %130 = vector.shape_cast %129 : vector<8xf32> to vector<8x1xf32>
    %cst_53 = arith.constant 3.200000e+01 : f32
    %131 = vector.broadcast %cst_53 : f32 to vector<8x1xf32>
    %132 = arith.divf %130, %131 : vector<8x1xf32>
    %133 = vector.broadcast %132 : vector<8x1xf32> to vector<8x32xf32>
    %134 = arith.subf %126, %133 : vector<8x32xf32>
    %135 = arith.mulf %134, %134 : vector<8x32xf32>
    %cst_54 = arith.constant dense<0.000000e+00> : vector<8xf32>
    %136 = vector.multi_reduction <add>, %135, %cst_54 [1] : vector<8x32xf32> to vector<8xf32>
    %137 = vector.shape_cast %136 : vector<8xf32> to vector<8x1xf32>
    %cst_55 = arith.constant 3.200000e+01 : f32
    %138 = vector.broadcast %cst_55 : f32 to vector<8x1xf32>
    %139 = arith.divf %137, %138 : vector<8x1xf32>
    %140 = vector.broadcast %132 : vector<8x1xf32> to vector<8x32xf32>
    %141 = arith.subf %126, %140 : vector<8x32xf32>
    %cst_56 = arith.constant 9.99999974E-6 : f32
    %142 = vector.broadcast %cst_56 : f32 to vector<8x1xf32>
    %143 = arith.addf %139, %142 : vector<8x1xf32>
    %144 = math.rsqrt %143 : vector<8x1xf32>
    %145 = vector.broadcast %144 : vector<8x1xf32> to vector<8x32xf32>
    %146 = arith.mulf %141, %145 : vector<8x32xf32>
    %147 = vector.broadcast %127 : vector<1x32xf32> to vector<8x32xf32>
    %148 = arith.mulf %146, %147 : vector<8x32xf32>
    %149 = vector.broadcast %128 : vector<1x32xf32> to vector<8x32xf32>
    %150 = arith.addf %148, %149 : vector<8x32xf32>
    %151 = arith.truncf %150 : vector<8x32xf32> to vector<8x32xbf16>
    %cst_57 = arith.constant 0.000000e+00 : f32
    %152 = vector.broadcast %cst_57 : f32 to vector<8x32xf32>
    %c0_58 = arith.constant 0 : index
    %c0_59 = arith.constant 0 : index
    %153 = vector.load %arg10[%c0_58, %c0_59] : memref<32x128xbf16, #tpu.memory_space<vmem>>, vector<32x32xbf16>
    %cst_60 = arith.constant dense<0.000000e+00> : vector<8x32xf32>
    %154 = tpu.matmul %151, %153, %cst_60 {dimension_numbers = #tpu.dot_dimension_numbers<[1], [0], [0], [1], [0, 0, 1, 1], [], []>} : vector<8x32xbf16>, vector<32x32xbf16>, vector<8x32xf32> -> vector<8x32xf32>
    %c0_61 = arith.constant 0 : index
    %c0_62 = arith.constant 0 : index
    %155 = vector.load %arg11[%c0_61, %c0_62] : memref<1x128xf32, #tpu.memory_space<vmem>>, vector<1x32xf32>
    %156 = vector.broadcast %155 : vector<1x32xf32> to vector<8x32xf32>
    %157 = arith.addf %154, %156 : vector<8x32xf32>
    %cst_63 = arith.constant 1.702000e+00 : f32
    %158 = vector.broadcast %cst_63 : f32 to vector<8x32xf32>
    %159 = arith.mulf %158, %157 : vector<8x32xf32>
    %160 = arith.negf %159 : vector<8x32xf32>
    %161 = math.exp %160 : vector<8x32xf32>
    %cst_64 = arith.constant 1.000000e+00 : f32
    %162 = vector.broadcast %cst_64 : f32 to vector<8x32xf32>
    %163 = arith.addf %162, %161 : vector<8x32xf32>
    %164 = arith.divf %162, %163 : vector<8x32xf32>
    %165 = arith.mulf %157, %164 : vector<8x32xf32>
    %166 = arith.truncf %165 : vector<8x32xf32> to vector<8x32xbf16>
    %c0_65 = arith.constant 0 : index
    %c0_66 = arith.constant 0 : index
    %167 = vector.load %arg12[%c0_65, %c0_66] : memref<128x32xbf16, #tpu.memory_space<vmem>>, vector<32x32xbf16>
    %cst_67 = arith.constant dense<0.000000e+00> : vector<8x32xf32>
    %168 = tpu.matmul %166, %167, %cst_67 {dimension_numbers = #tpu.dot_dimension_numbers<[1], [0], [0], [1], [0, 0, 1, 1], [], []>} : vector<8x32xbf16>, vector<32x32xbf16>, vector<8x32xf32> -> vector<8x32xf32>
    %169 = arith.addf %152, %168 : vector<8x32xf32>
    %c0_68 = arith.constant 0 : index
    %c32 = arith.constant 32 : index
    %170 = vector.load %arg10[%c0_68, %c32] : memref<32x128xbf16, #tpu.memory_space<vmem>>, vector<32x32xbf16>
    %cst_69 = arith.constant dense<0.000000e+00> : vector<8x32xf32>
    %171 = tpu.matmul %151, %170, %cst_69 {dimension_numbers = #tpu.dot_dimension_numbers<[1], [0], [0], [1], [0, 0, 1, 1], [], []>} : vector<8x32xbf16>, vector<32x32xbf16>, vector<8x32xf32> -> vector<8x32xf32>
    %c0_70 = arith.constant 0 : index
    %c32_71 = arith.constant 32 : index
    %172 = vector.load %arg11[%c0_70, %c32_71] : memref<1x128xf32, #tpu.memory_space<vmem>>, vector<1x32xf32>
    %173 = vector.broadcast %172 : vector<1x32xf32> to vector<8x32xf32>
    %174 = arith.addf %171, %173 : vector<8x32xf32>
    %cst_72 = arith.constant 1.702000e+00 : f32
    %175 = vector.broadcast %cst_72 : f32 to vector<8x32xf32>
    %176 = arith.mulf %175, %174 : vector<8x32xf32>
    %177 = arith.negf %176 : vector<8x32xf32>
    %178 = math.exp %177 : vector<8x32xf32>
    %cst_73 = arith.constant 1.000000e+00 : f32
    %179 = vector.broadcast %cst_73 : f32 to vector<8x32xf32>
    %180 = arith.addf %179, %178 : vector<8x32xf32>
    %181 = arith.divf %179, %180 : vector<8x32xf32>
    %182 = arith.mulf %174, %181 : vector<8x32xf32>
    %183 = arith.truncf %182 : vector<8x32xf32> to vector<8x32xbf16>
    %c32_74 = arith.constant 32 : index
    %c0_75 = arith.constant 0 : index
    %184 = vector.load %arg12[%c32_74, %c0_75] : memref<128x32xbf16, #tpu.memory_space<vmem>>, vector<32x32xbf16>
    %cst_76 = arith.constant dense<0.000000e+00> : vector<8x32xf32>
    %185 = tpu.matmul %183, %184, %cst_76 {dimension_numbers = #tpu.dot_dimension_numbers<[1], [0], [0], [1], [0, 0, 1, 1], [], []>} : vector<8x32xbf16>, vector<32x32xbf16>, vector<8x32xf32> -> vector<8x32xf32>
    %186 = arith.addf %169, %185 : vector<8x32xf32>
    %c0_77 = arith.constant 0 : index
    %c64 = arith.constant 64 : index
    %187 = vector.load %arg10[%c0_77, %c64] : memref<32x128xbf16, #tpu.memory_space<vmem>>, vector<32x32xbf16>
    %cst_78 = arith.constant dense<0.000000e+00> : vector<8x32xf32>
    %188 = tpu.matmul %151, %187, %cst_78 {dimension_numbers = #tpu.dot_dimension_numbers<[1], [0], [0], [1], [0, 0, 1, 1], [], []>} : vector<8x32xbf16>, vector<32x32xbf16>, vector<8x32xf32> -> vector<8x32xf32>
    %c0_79 = arith.constant 0 : index
    %c64_80 = arith.constant 64 : index
    %189 = vector.load %arg11[%c0_79, %c64_80] : memref<1x128xf32, #tpu.memory_space<vmem>>, vector<1x32xf32>
    %190 = vector.broadcast %189 : vector<1x32xf32> to vector<8x32xf32>
    %191 = arith.addf %188, %190 : vector<8x32xf32>
    %cst_81 = arith.constant 1.702000e+00 : f32
    %192 = vector.broadcast %cst_81 : f32 to vector<8x32xf32>
    %193 = arith.mulf %192, %191 : vector<8x32xf32>
    %194 = arith.negf %193 : vector<8x32xf32>
    %195 = math.exp %194 : vector<8x32xf32>
    %cst_82 = arith.constant 1.000000e+00 : f32
    %196 = vector.broadcast %cst_82 : f32 to vector<8x32xf32>
    %197 = arith.addf %196, %195 : vector<8x32xf32>
    %198 = arith.divf %196, %197 : vector<8x32xf32>
    %199 = arith.mulf %191, %198 : vector<8x32xf32>
    %200 = arith.truncf %199 : vector<8x32xf32> to vector<8x32xbf16>
    %c64_83 = arith.constant 64 : index
    %c0_84 = arith.constant 0 : index
    %201 = vector.load %arg12[%c64_83, %c0_84] : memref<128x32xbf16, #tpu.memory_space<vmem>>, vector<32x32xbf16>
    %cst_85 = arith.constant dense<0.000000e+00> : vector<8x32xf32>
    %202 = tpu.matmul %200, %201, %cst_85 {dimension_numbers = #tpu.dot_dimension_numbers<[1], [0], [0], [1], [0, 0, 1, 1], [], []>} : vector<8x32xbf16>, vector<32x32xbf16>, vector<8x32xf32> -> vector<8x32xf32>
    %203 = arith.addf %186, %202 : vector<8x32xf32>
    %c0_86 = arith.constant 0 : index
    %c96 = arith.constant 96 : index
    %204 = vector.load %arg10[%c0_86, %c96] : memref<32x128xbf16, #tpu.memory_space<vmem>>, vector<32x32xbf16>
    %cst_87 = arith.constant dense<0.000000e+00> : vector<8x32xf32>
    %205 = tpu.matmul %151, %204, %cst_87 {dimension_numbers = #tpu.dot_dimension_numbers<[1], [0], [0], [1], [0, 0, 1, 1], [], []>} : vector<8x32xbf16>, vector<32x32xbf16>, vector<8x32xf32> -> vector<8x32xf32>
    %c0_88 = arith.constant 0 : index
    %c96_89 = arith.constant 96 : index
    %206 = vector.load %arg11[%c0_88, %c96_89] : memref<1x128xf32, #tpu.memory_space<vmem>>, vector<1x32xf32>
    %207 = vector.broadcast %206 : vector<1x32xf32> to vector<8x32xf32>
    %208 = arith.addf %205, %207 : vector<8x32xf32>
    %cst_90 = arith.constant 1.702000e+00 : f32
    %209 = vector.broadcast %cst_90 : f32 to vector<8x32xf32>
    %210 = arith.mulf %209, %208 : vector<8x32xf32>
    %211 = arith.negf %210 : vector<8x32xf32>
    %212 = math.exp %211 : vector<8x32xf32>
    %cst_91 = arith.constant 1.000000e+00 : f32
    %213 = vector.broadcast %cst_91 : f32 to vector<8x32xf32>
    %214 = arith.addf %213, %212 : vector<8x32xf32>
    %215 = arith.divf %213, %214 : vector<8x32xf32>
    %216 = arith.mulf %208, %215 : vector<8x32xf32>
    %217 = arith.truncf %216 : vector<8x32xf32> to vector<8x32xbf16>
    %c96_92 = arith.constant 96 : index
    %c0_93 = arith.constant 0 : index
    %218 = vector.load %arg12[%c96_92, %c0_93] : memref<128x32xbf16, #tpu.memory_space<vmem>>, vector<32x32xbf16>
    %cst_94 = arith.constant dense<0.000000e+00> : vector<8x32xf32>
    %219 = tpu.matmul %217, %218, %cst_94 {dimension_numbers = #tpu.dot_dimension_numbers<[1], [0], [0], [1], [0, 0, 1, 1], [], []>} : vector<8x32xbf16>, vector<32x32xbf16>, vector<8x32xf32> -> vector<8x32xf32>
    %220 = arith.addf %203, %219 : vector<8x32xf32>
    %c0_95 = arith.constant 0 : index
    %c0_96 = arith.constant 0 : index
    %221 = vector.load %arg13[%c0_95, %c0_96] : memref<1x32xf32, #tpu.memory_space<vmem>>, vector<1x32xf32>
    %222 = vector.broadcast %221 : vector<1x32xf32> to vector<8x32xf32>
    %223 = arith.addf %220, %222 : vector<8x32xf32>
    %224 = arith.addf %126, %223 : vector<8x32xf32>
    %225 = vector.shape_cast %224 : vector<8x32xf32> to vector<1x8x32xf32>
    %c0_97 = arith.constant 0 : index
    %c0_98 = arith.constant 0 : index
    %c0_99 = arith.constant 0 : index
    %226 = vector.load %arg14[%c0_97, %c0_98, %c0_99] : memref<1x8x32xf32, #tpu.memory_space<vmem>>, vector<1x8x32xf32>
    tpu.vector_store %arg14[%c0_97, %c0_98, %c0_99], %225 {strides = array<i32>} : memref<1x8x32xf32, #tpu.memory_space<vmem>>, vector<1x8x32xf32>,
    return
  }
  func.func @transform_0(%arg0: i32) -> (i32, i32, i32) {
    %c0_i32 = arith.constant 0 : i32
    %c0_i32_0 = arith.constant 0 : i32
    %c0_i32_1 = arith.constant 0 : i32
    return %arg0, %c0_i32, %c0_i32_0 : i32, i32, i32
  }
  func.func @transform_1(%arg0: i32) -> (i32, i32) {
    %c0_i32 = arith.constant 0 : i32
    %c0_i32_0 = arith.constant 0 : i32
    %c0_i32_1 = arith.constant 0 : i32
    return %c0_i32, %c0_i32_0 : i32, i32
  }
  func.func @transform_2(%arg0: i32) -> (i32, i32) {
    %c0_i32 = arith.constant 0 : i32
    %c0_i32_0 = arith.constant 0 : i32
    %c0_i32_1 = arith.constant 0 : i32
    return %c0_i32, %c0_i32_0 : i32, i32
  }
  func.func @transform_3(%arg0: i32) -> (i32, i32) {
    %c0_i32 = arith.constant 0 : i32
    %c0_i32_0 = arith.constant 0 : i32
    %c0_i32_1 = arith.constant 0 : i32
    return %c0_i32, %c0_i32_0 : i32, i32
  }
  func.func @transform_4(%arg0: i32) -> (i32, i32) {
    %c0_i32 = arith.constant 0 : i32
    %c0_i32_0 = arith.constant 0 : i32
    %c0_i32_1 = arith.constant 0 : i32
    return %c0_i32, %c0_i32_0 : i32, i32
  }
  func.func @transform_5(%arg0: i32) -> (i32, i32) {
    %c0_i32 = arith.constant 0 : i32
    %c0_i32_0 = arith.constant 0 : i32
    %c0_i32_1 = arith.constant 0 : i32
    return %c0_i32, %c0_i32_0 : i32, i32
  }
  func.func @transform_6(%arg0: i32) -> (i32, i32) {
    %c0_i32 = arith.constant 0 : i32
    %c0_i32_0 = arith.constant 0 : i32
    %c0_i32_1 = arith.constant 0 : i32
    return %c0_i32, %c0_i32_0 : i32, i32
  }
  func.func @transform_7(%arg0: i32) -> (i32, i32) {
    %c0_i32 = arith.constant 0 : i32
    %c0_i32_0 = arith.constant 0 : i32
    %c0_i32_1 = arith.constant 0 : i32
    return %c0_i32, %c0_i32_0 : i32, i32
  }
  func.func @transform_8(%arg0: i32) -> (i32, i32) {
    %c0_i32 = arith.constant 0 : i32
    %c0_i32_0 = arith.constant 0 : i32
    %c0_i32_1 = arith.constant 0 : i32
    return %c0_i32, %c0_i32_0 : i32, i32
  }
  func.func @transform_9(%arg0: i32) -> (i32, i32) {
    %c0_i32 = arith.constant 0 : i32
    %c0_i32_0 = arith.constant 0 : i32
    %c0_i32_1 = arith.constant 0 : i32
    return %c0_i32, %c0_i32_0 : i32, i32
  }
  func.func @transform_10(%arg0: i32) -> (i32, i32) {
    %c0_i32 = arith.constant 0 : i32
    %c0_i32_0 = arith.constant 0 : i32
    %c0_i32_1 = arith.constant 0 : i32
    return %c0_i32, %c0_i32_0 : i32, i32
  }
  func.func @transform_11(%arg0: i32) -> (i32, i32) {
    %c0_i32 = arith.constant 0 : i32
    %c0_i32_0 = arith.constant 0 : i32
    %c0_i32_1 = arith.constant 0 : i32
    return %c0_i32, %c0_i32_0 : i32, i32
  }
  func.func @transform_12(%arg0: i32) -> (i32, i32) {
    %c0_i32 = arith.constant 0 : i32
    %c0_i32_0 = arith.constant 0 : i32
    %c0_i32_1 = arith.constant 0 : i32
    return %c0_i32, %c0_i32_0 : i32, i32
  }
  func.func @transform_13(%arg0: i32) -> (i32, i32, i32) {
    %c0_i32 = arith.constant 0 : i32
    %c0_i32_0 = arith.constant 0 : i32
    %c0_i32_1 = arith.constant 0 : i32
    return %arg0, %c0_i32, %c0_i32_0 : i32, i32, i32
  }
}

</mosaic_0001>

<bundles_post_ra>
// kernel: tpu_custom_call.1
= control target key start
LH: loop header
LB: loop body
LE: loop exit
PB: predicated region body
PF: predicated region fallthrough
CT: control target
= control target key end

     0   :  { %s2451_s0 = inlined_call_operand.vmem [shape: f32[2,8,32], index: 0, kind: input, shape index: {}]   ;;  %s2452_s1 = inlined_call_operand.vmem [shape: f32[1,32], index: 1, kind: input, shape index: {}]   ;;  %s2453_s2 = inlined_call_operand.vmem [shape: f32[1,32], index: 2, kind: input, shape index: {}]   ;;  %s2454_s3 = inlined_call_operand.vmem [shape: bf16[32,96], index: 3, kind: input, shape index: {}]   ;;  %s2455_s4 = inlined_call_operand.vmem [shape: f32[1,96], index: 4, kind: input, shape index: {}]   ;;  %s2456_s5 = inlined_call_operand.vmem [shape: bf16[32,32], index: 5, kind: input, shape index: {}]   ;;  %s2457_s6 = inlined_call_operand.vmem [shape: f32[1,32], index: 6, kind: input, shape index: {}]   ;;  %s2458_s7 = inlined_call_operand.vmem [shape: f32[1,32], index: 7, kind: input, shape index: {}]   ;;  %s2459_s8 = inlined_call_operand.vmem [shape: f32[1,32], index: 8, kind: input, shape index: {}]   ;;  %s2460_s9 = inlined_call_operand.vmem [shape: bf16[32,128], index: 9, kind: input, shape index: {}]   ;;  %s2461_s10 = inlined_call_operand.vmem [shape: f32[1,128], index: 10, kind: input, shape index: {}]   ;;  %s2462_s11 = inlined_call_operand.vmem [shape: bf16[128,32], index: 11, kind: input, shape index: {}]   ;;  %s2463_s12 = inlined_call_operand.vmem [shape: f32[1,32], index: 12, kind: input, shape index: {}]   ;;  %s2464_s13 = inlined_call_operand.hbm [shape: f32[2,8,32], index: 13, kind: output, shape index: {}]  }
   0x1   :  { %2465 = sst [smem:[#allocation6_spill]] %s2451_s0 }
   0x2   :  { %2466 = sst [smem:[#allocation7_spill]] %s2452_s1 }
   0x3   :  { %2467 = sst [smem:[#allocation8_spill]] %s2453_s2 }
   0x4   :  { %18 = vsyncpa [#allocation4], 0 }
   0x5   :  { %20 = vsyncpa [#allocation4 + $0x1], 0  ;;  %s2150_s25 = smov 0   ;;  %s2152_s26 = smov 0  }
   0x6   :  { %s2154_s27 = smov 0   ;;  %s2156_s28 = smov 0  }
   0x7 LB: > { %s2171_s29 = sadd.s32 4294967295, %s2060_s28   ;;  %s1666_s30 = sadd.s32 4294967294, %s2060_s28   ;;  %s2060_s28 = sphi %s2156_s28, %s2476_s28   ;;  %s2056_s27 = sphi %s2154_s27, %s2475_s27   ;;  %s2052_s26 = sphi %s2152_s26, %s2474_s26   ;;  %s2048_s25 = sphi %s2150_s25, %s2473_s25  }
   0x8   : > { %s2175_s14 = sadd.s32 1, %s2060_s28   ;;  %s311_s15 = sadd.s32 1, %s2056_s27 }
   0x9   : > { %s308_s16 = ssub.s32 %s2060_s28, %s2175_s14  ;;  %p321_p0 = scmp.ne.s32.totalorder %s2056_s27, %s2052_s26 }
   0xa   : > { %p309_p1 = scmp.eq.s32.totalorder %s308_s16, 0  ;;  %p322_p2 = scmp.eq.s32.totalorder %s2171_s29, 1 }
   0xb   : > { %p327_p3 = scmp.ne.s32.totalorder %s2052_s26, %s2048_s25  ;;  %p328_p4 = scmp.eq.s32.totalorder %s1666_s30, 1 }
   0xc   : > { %s2186_s17 = scalar_select %p309_p1, %s2056_s27, %s311_s15  }
   0xd   : > { %p2188_p5 = por %p322_p2, %p321_p0  ;;  %p2192_p6 = por %p328_p4, %p327_p3 }
   0xe   : > { %p1669_p7 = scmp.ge.s32.totalorder %s2060_s28, 1  ;;  %p389_p8 = scmp.lt.s32.totalorder %s2060_s28, 3 }
  0x10   : > { %p390_p9 = pnand %p1669_p7, %p389_p8 }
  0x11   : > { %p432_p10 = scmp.lt.s32.totalorder (!%p390_p9), %s2171_s29, 1  ;;  %s2470_s0 = sld [smem:[#allocation6_spill]] (!%p390_p9) }
  0x12   : > { %393 = sbr.rel (%p390_p9) target bundleno = 2746 (0xaba), region = 72  ;;  %s2471_s1 = sld [smem:[#allocation7_spill]] (!%p390_p9) }
  0x13   : > { %s2472_s2 = sld [smem:[#allocation8_spill]] (!%p390_p9)  ;;  %s2064_s16 = smov (!%p390_p9), 120  }
  0x14   : > { %s2067_s22 = smov (!%p390_p9), 80   ;;  %s2068_s23 = smov (!%p390_p9), 112  }
  0x15   : > { %s2070_s30 = smov (!%p390_p9), 104   ;;  %s2071_s15 = smov (!%p390_p9), 64  }
  0x17   : > { %s433_s20 = scalar_select %p432_p10, %s2171_s29, 1  ;;  %vm440_vm0 = vcmask 261120   ;;  %v1950_v7 = vld [vmem:[%s2454_s3 + $0x8] sm:$0xff]   ;;  %v2062_v8 = vmov 0.0   ;;  %vm2063_vm1 = vmmov 0   ;;  %v1951_v9 = vld [vmem:[%s2454_s3] sm:$0xff]  }
  0x18   : > { %1766 = vmatprep.subr.bf16.mxu0 %v2062_v8  ;;  %1770 = vmatprep.mubr.msk.bf16.mxu0 %vm2063_vm1, %v2062_v8  ;;  %v1672_v14 = vld [vmem:[%s2471_s1] ss:$0 sm:$0xff]  ;;  %vm540_vm2 = vcmask 64512   ;;  %vm604_vm3 = vcmask 1043456   ;;  %vm763_vm4 = vcmask 130112   ;;  %vm879_vm5 = vcmask 195712  }
  0x19   : > { %s1671_s21 = sshll.u32 %s433_s20, 3  ;;  %1767 = vmatpush3.bf16.msra.mxu0 %v1950_v7  ;;  %1774 = vmatprep.subr.bf16.mxu1 %v2062_v8  ;;  %v1673_v16 = vld [vmem:[%s2472_s2] ss:$0 sm:$0xff]  ;;  %s2065_s20 = smov 96   ;;  %vm995_vm6 = vcmask 261312  }
  0x1a   : > { %s435_s24 = scalar_lea.vmem %s2470_s0, %s1671_s21  ;;  %1768 = vmatprep.subr.bf16.mxu0 %v2062_v8  ;;  %1776 = vmatprep.mubr.msk.bf16.mxu1 %vm2063_vm1, %v2062_v8  ;;  %v1674_v20 = vld [vmem:[%s2455_s4] ss:$0 sm:$0xff]  ;;  %s2066_s21 = smov 88  }
  0x1b   : > { %v2203_v0 = vld [vmem:[%s435_s24] sm:$0xff]  ;;  %s2069_s24 = smov 72  }
  0x1c   : > { %v441_v1 = vsel %vm440_vm0, %v2203_v0, 0.0 }
  0x1d   : > { %442 = vadd.xlane.f32.xlu0 %v441_v1  ;;  %1769 = vmatpush3.bf16.msra.mxu0 %v1951_v9 }
  0x1e   : > { %1780 = vmatprep.subr.bf16.mxu0 %v2062_v8 }
  0xa6   : > { %v443_v2 = vpop.xlane.xlu0 %442 }
  0xa7   : > { %v445_v3 = vmul.f32 0.03125, %v443_v2 }
  0xa9   : > { %v446_v4 = vsub.f32 %v2203_v0, %v445_v3 }
  0xab   : > { %v447_v5 = vmul.f32 %v446_v4, %v446_v4 }
  0xad   : > { %v448_v6 = vsel %vm440_vm0, %v447_v5, 0.0 }
  0xae   : > { %449 = vadd.xlane.f32.xlu0 %v448_v6 }
 0x137   : > { %v450_v10 = vpop.xlane.xlu0 %449 }
 0x138   : > { %v451_v11 = vmul.f32 0.03125, %v450_v10 }
 0x13a   : > { %v452_v12 = vadd.f32 1e-05, %v451_v11 }
 0x13c   : > { %1964 = vrsqrt.f32 %v452_v12 }
 0x149   : > { %v1965_v13 = vpop.eup %1964 }
 0x14a   : > { %v454_v15 = vmul.f32 %v1965_v13, %v446_v4 }
 0x14c   : > { %v461_v17 = vmul.f32 %v1672_v14, %v454_v15 }
 0x14e   : > { %v468_v18 = vadd.f32 %v1673_v16, %v461_v17 }
 0x150   : > { %v469_v19 = vpack.c.bf16 %v468_v18, %v468_v18 }
 0x152   : > { %1771 = vmatmul.mubr.msk.bf16.vlgmr.msra.gmra.mxu0 %vm440_vm0, %v469_v19 }
 0x153   : > { %1782 = vmatprep.mubr.msk.bf16.mxu0 %vm2063_vm1, %v2062_v8 }
 0x212   : > { %v530_v21 = vpop.f32.mrf.mxu0 }
 0x213   : > { %v531_v22 = vadd.f32 %v1674_v20, %v530_v21 }
 0x214   : > { %v1772_v23 = vpop.f32.mrf.mxu0 }
 0x215   : > { %v2235_v24 = vpack.c.bf16 %v531_v22, %v531_v22 }
 0x216   : > { %v533_v25 = vpop.f32.mrf.mxu0 }
 0x217   : > { %649 = vrot.lane.b32.xlu0 %v2235_v24, %s2064_s16  ;;  %538 = vrot.lane.b32.xlu1 %v2235_v24, %s2065_s20  ;;  %s2072_s16 = smov 56  }
 0x218   : > { %v1773_v26 = vpop.f32.mrf.mxu0 }
 0x21b   : > { %651 = vrot.lane.b32.xlu1 %v2235_v24, %s2066_s21  ;;  %s2073_s21 = smov 48  }
 0x21f   : > { %767 = vrot.lane.b32.xlu1 %v2235_v24, %s2067_s22  ;;  %s2074_s22 = smov 40  }
 0x223   : > { %765 = vrot.lane.b32.xlu1 %v2235_v24, %s2068_s23  ;;  %s2075_s23 = smov 8  }
 0x227   : > { %883 = vrot.lane.b32.xlu1 %v2235_v24, %s2069_s24 }
 0x22b   : > { %881 = vrot.lane.b32.xlu1 %v2235_v24, %s2070_s30 }
 0x289   : > { %v539_v27 = vpop.permute.xlu1 %538  ;;  %v650_v32 = vpop.permute.xlu0 %649 }
 0x28a   : > { %v545_v28 = vsel %vm540_vm2, %v539_v27, 0 }
 0x28b   : > { %1775 = vmatpush3.bf16.xpose.msra.mxu1 %v545_v28 }
 0x28c   : > { %1786 = vmatprep.subr.bf16.mxu1 %v2062_v8 }
 0x28d   : > { %v652_v29 = vpop.permute.xlu1 %651 }
 0x28e   : > { %v657_v30 = vsel %vm540_vm2, %v652_v29, 0 }
 0x291   : > { %v768_v31 = vpop.permute.xlu1 %767 }
 0x292   : > { %1777 = vmatmul.mubr.msk.bf16.vlgmr.msra.gmra.mxu1 %vm540_vm2, %v2235_v24  ;;  %v773_v34 = vsel %vm540_vm2, %v768_v31, 0 }
 0x293   : > { %1787 = vmatpush3.bf16.xpose.msra.mxu1 %v657_v30  ;;  %1788 = vmatprep.mubr.msk.bf16.mxu1 %vm2063_vm1, %v2062_v8 }
 0x294   : > { %1798 = vmatprep.subr.bf16.mxu1 %v2062_v8 }
 0x295   : > { %v766_v33 = vpop.permute.xlu1 %765 }
 0x299   : > { %v884_v35 = vpop.permute.xlu1 %883 }
 0x29a   : > { %1789 = vmatmul.mubr.msk.bf16.vlgmr.msra.gmra.mxu1 %vm540_vm2, %v650_v32  ;;  %v889_v36 = vsel %vm540_vm2, %v884_v35, 0 }
 0x29b   : > { %1799 = vmatpush3.bf16.xpose.msra.mxu1 %v773_v34  ;;  %1800 = vmatprep.mubr.msk.bf16.mxu1 %vm2063_vm1, %v2062_v8 }
 0x29c   : > { %1810 = vmatprep.subr.bf16.mxu1 %v2062_v8 }
 0x29d   : > { %v882_v37 = vpop.permute.xlu1 %881 }
 0x2a2   : > { %1801 = vmatmul.mubr.msk.bf16.vlgmr.msra.gmra.mxu1 %vm540_vm2, %v766_v33 }
 0x2a3   : > { %1811 = vmatpush3.bf16.xpose.msra.mxu1 %v889_v36  ;;  %1812 = vmatprep.mubr.msk.bf16.mxu1 %vm2063_vm1, %v2062_v8 }
 0x2a4   : > { %1822 = vmatprep.subr.bf16.mxu1 %v2062_v8 }
 0x2aa   : > { %1813 = vmatmul.mubr.msk.bf16.vlgmr.msra.gmra.mxu1 %vm540_vm2, %v882_v37 }
 0x2ab   : > { %1826 = vmatprep.mubr.msk.bf16.mxu1 %vm2063_vm1, %v2062_v8 }
 0x352   : > { %v581_v38 = vpop.f32.mrf.mxu1 }
 0x353   : > { %v587_v39 = vsel %vm540_vm2, %v581_v38, -inf }
 0x354   : > { %588 = vmax.xlane.f32.xlu1 %v587_v39  ;;  %v1778_v40 = vpop.f32.mrf.mxu1 }
 0x356   : > { %v584_v41 = vpop.f32.mrf.mxu1 }
 0x358   : > { %v1779_v42 = vpop.f32.mrf.mxu1 }
 0x35a   : > { %v693_v43 = vpop.f32.mrf.mxu1 }
 0x35b   : > { %v699_v44 = vsel %vm540_vm2, %v693_v43, -inf }
 0x35c   : > { %700 = vmax.xlane.f32.xlu0 %v699_v44  ;;  %v1790_v45 = vpop.f32.mrf.mxu1 }
 0x35e   : > { %v696_v46 = vpop.f32.mrf.mxu1 }
 0x360   : > { %v1791_v47 = vpop.f32.mrf.mxu1 }
 0x362   : > { %v809_v48 = vpop.f32.mrf.mxu1 }
 0x363   : > { %v815_v49 = vsel %vm540_vm2, %v809_v48, -inf }
 0x364   : > { %816 = vmax.xlane.f32.xlu1 %v815_v49  ;;  %v1802_v50 = vpop.f32.mrf.mxu1  ;;  %v1953_v49 = vld [vmem:[%s2456_s5] sm:$0xff]  }
 0x366   : > { %v812_v51 = vpop.f32.mrf.mxu1 }
 0x368   : > { %v1803_v52 = vpop.f32.mrf.mxu1 }
 0x36a   : > { %v925_v53 = vpop.f32.mrf.mxu1 }
 0x36b   : > { %v931_v54 = vsel %vm540_vm2, %v925_v53, -inf }
 0x36c   : > { %932 = vmax.xlane.f32.xlu0 %v931_v54  ;;  %v1814_v55 = vpop.f32.mrf.mxu1 }
 0x36e   : > { %v928_v56 = vpop.f32.mrf.mxu1 }
 0x370   : > { %v1815_v57 = vpop.f32.mrf.mxu1 }
 0x3dd   : > { %v589_v58 = vpop.xlane.xlu1 %588 }
 0x3de   : > { %v590_v59 = vsub.f32 %v581_v38, %v589_v58 }
 0x3e0   : > { %v591_v60 = vmul.f32 1.442695, %v590_v59 }
 0x3e2   : > { %1966 = vpow2.f32 %v591_v60 }
 0x3e5   : > { %v701_v61 = vpop.xlane.xlu0 %700 }
 0x3e6   : > { %v702_v62 = vsub.f32 %v693_v43, %v701_v61 }
 0x3e8   : > { %v703_v63 = vmul.f32 1.442695, %v702_v62 }
 0x3ea   : > { %1968 = vpow2.f32 %v703_v63  ;;  %v1686_v63 = vld [vmem:[%s2457_s6] ss:$0 sm:$0xff] }
 0x3ed   : > { %v817_v11 = vpop.xlane.xlu1 %816 }
 0x3ee   : > { %v818_v12 = vsub.f32 %v809_v48, %v817_v11  ;;  %v1952_v48 = vld [vmem:[%s2456_s5 + $0x8] sm:$0xff]  }
 0x3ef   : > { %v1967_v1 = vpop.eup %1966  ;;  %1823 = vmatpush3.bf16.msra.mxu1 %v1952_v48 }
 0x3f0   : > { %v593_v2 = vsel %vm540_vm2, %v1967_v1, 0.0  ;;  %v819_v13 = vmul.f32 1.442695, %v818_v12  ;;  %1824 = vmatprep.subr.bf16.mxu1 %v2062_v8 }
 0x3f1   : > { %594 = vadd.xlane.f32.xlu1 %v593_v2 }
 0x3f3   : > { %1825 = vmatpush3.bf16.msra.mxu1 %v1953_v49 }
 0x3f4   : > { %1838 = vmatprep.subr.bf16.mxu1 %v2062_v8 }
 0x3f5   : > { %v933_v3 = vpop.xlane.xlu0 %932 }
 0x3f6   : > { %v934_v4 = vsub.f32 %v925_v53, %v933_v3 }
 0x3f7   : > { %v1969_v5 = vpop.eup %1968 }
 0x3f8   : > { %v935_v6 = vmul.f32 1.442695, %v934_v4  ;;  %v705_v7 = vsel %vm540_vm2, %v1969_v5, 0.0 }
 0x3f9   : > { %706 = vadd.xlane.f32.xlu0 %v705_v7 }
 0x3fa   : > { %1970 = vpow2.f32 %v935_v6 }
 0x3fb   : > { %1972 = vpow2.f32 %v819_v13 }
 0x402   : > { %599 = vrot.lane.b32.xlu1 %v2235_v24, %s2071_s15 }
 0x407   : > { %v1971_v9 = vpop.eup %1970 }
 0x408   : > { %v937_v10 = vsel %vm540_vm2, %v1971_v9, 0.0  ;;  %v1973_v14 = vpop.eup %1972 }
 0x409   : > { %938 = vadd.xlane.f32.xlu0 %v937_v10  ;;  %v821_v15 = vsel %vm540_vm2, %v1973_v14, 0.0  ;;  %v1955_v10 = vld [vmem:[%s2460_s9] sm:$0xff]  }
 0x41f   : > { %711 = vrot.lane.b32.xlu0 %v2235_v24, %s2072_s16  ;;  %s2078_s16 = smov 32  }
 0x426   : > { %822 = vadd.xlane.f32.xlu1 %v821_v15  ;;  %v1692_v15 = vld [vmem:[%s2461_s10] ss:$0 sm:$0xff] }
 0x437   : > { %827 = vrot.lane.b32.xlu1 %v2235_v24, %s2073_s21 }
 0x43b   : > { %943 = vrot.lane.b32.xlu1 %v2235_v24, %s2074_s22  ;;  %s2076_s22 = smov 16  }
 0x47a   : > { %v595_v16 = vpop.xlane.xlu1 %594 }
 0x47b   : > { %1974 = vrcp.f32 %v595_v16 }
 0x47e   : > { %v600_v17 = vpop.permute.xlu1 %599 }
 0x47f   : > { %v606_v18 = vsel %vm604_vm3, %v600_v17, 0 }
 0x480   : > { %1781 = vmatpush3.bf16.msra.mxu0 %v606_v18 }
 0x481   : > { %1792 = vmatprep.subr.bf16.mxu0 %v2062_v8 }
 0x482   : > { %v707_v19 = vpop.xlane.xlu0 %706 }
 0x483   : > { %1976 = vrcp.f32 %v707_v19 }
 0x488   : > { %v1975_v20 = vpop.eup %1974 }
 0x489   : > { %v597_v21 = vmul.f32 %v1975_v20, %v1967_v1 }
 0x48b   : > { %v598_v22 = vpack.c.bf16 %v597_v21, %v597_v21 }
 0x48d   : > { %1783 = vmatmul.mubr.msk.bf16.vlgmr.msra.gmra.mxu0 %vm540_vm2, %v598_v22  ;;  %v1690_v22 = vld [vmem:[%s2458_s7] ss:$0 sm:$0xff] }
 0x48e   : > { %1794 = vmatprep.mubr.msk.bf16.mxu0 %vm2063_vm1, %v2062_v8 }
 0x490   : > { %v1977_v23 = vpop.eup %1976 }
 0x491   : > { %v709_v25 = vmul.f32 %v1977_v23, %v1969_v5 }
 0x492   : > { %v939_v24 = vpop.xlane.xlu0 %938 }
 0x493   : > { %v710_v28 = vpack.c.bf16 %v709_v25, %v709_v25 }
 0x496   : > { %v712_v26 = vpop.permute.xlu0 %711 }
 0x497   : > { %v717_v27 = vsel %vm604_vm3, %v712_v26, 0 }
 0x498   : > { %1793 = vmatpush3.bf16.msra.mxu0 %v717_v27 }
 0x499   : > { %1804 = vmatprep.subr.bf16.mxu0 %v2062_v8 }
 0x49b   : > { %1795 = vmatmul.mubr.msk.bf16.vlgmr.msra.gmra.mxu0 %vm540_vm2, %v710_v28  ;;  %v1956_v28 = vld [vmem:[%s2462_s11 + $0x18] sm:$0xff]  }
 0x49c   : > { %1806 = vmatprep.mubr.msk.bf16.mxu0 %vm2063_vm1, %v2062_v8 }
 0x4af   : > { %v823_v29 = vpop.xlane.xlu1 %822 }
 0x4b0   : > { %1978 = vrcp.f32 %v823_v29  ;;  %v1957_v29 = vld [vmem:[%s2462_s11 + $0x8] sm:$0xff]  }
 0x4b1   : > { %1980 = vrcp.f32 %v939_v24  ;;  %v1691_v24 = vld [vmem:[%s2459_s8] ss:$0 sm:$0xff] }
 0x4b3   : > { %v828_v30 = vpop.permute.xlu1 %827 }
 0x4b4   : > { %v833_v31 = vsel %vm604_vm3, %v828_v30, 0  ;;  %v1958_v30 = vld [vmem:[%s2462_s11 + $0x10] sm:$0xff]  }
 0x4b5   : > { %1805 = vmatpush3.bf16.msra.mxu0 %v833_v31  ;;  %v1959_v31 = vld [vmem:[%s2462_s11] sm:$0xff]  }
 0x4b6   : > { %1816 = vmatprep.subr.bf16.mxu0 %v2062_v8 }
 0x4b7   : > { %v944_v34 = vpop.permute.xlu1 %943 }
 0x4b8   : > { %v949_v37 = vsel %vm604_vm3, %v944_v34, 0 }
 0x4bd   : > { %v1979_v32 = vpop.eup %1978 }
 0x4be   : > { %v825_v33 = vmul.f32 %v1979_v32, %v1973_v14  ;;  %v1981_v36 = vpop.eup %1980 }
 0x4bf   : > { %v941_v38 = vmul.f32 %v1981_v36, %v1971_v9  ;;  %v1954_v9 = vld [vmem:[%s2460_s9 + $0x8] sm:$0xff]  }
 0x4c0   : > { %v826_v35 = vpack.c.bf16 %v825_v33, %v825_v33 }
 0x4c1   : > { %v942_v39 = vpack.c.bf16 %v941_v38, %v941_v38 }
 0x4c2   : > { %1807 = vmatmul.mubr.msk.bf16.vlgmr.msra.gmra.mxu0 %vm540_vm2, %v826_v35 }
 0x4c3   : > { %1817 = vmatpush3.bf16.msra.mxu0 %v949_v37  ;;  %1818 = vmatprep.mubr.msk.bf16.mxu0 %vm2063_vm1, %v2062_v8 }
 0x4c4   : > { %1830 = vmatprep.subr.bf16.mxu0 %v2062_v8 }
 0x4ca   : > { %1819 = vmatmul.mubr.msk.bf16.vlgmr.msra.gmra.mxu0 %vm540_vm2, %v942_v39 }
 0x4cb   : > { %1834 = vmatprep.mubr.msk.bf16.mxu0 %vm2063_vm1, %v2062_v8  ;;  %1831 = vmatpush3.bf16.msra.mxu0 %v1954_v9 }
 0x4cc   : > { %1832 = vmatprep.subr.bf16.mxu0 %v2062_v8 }
 0x4cf   : > { %1833 = vmatpush3.bf16.msra.mxu0 %v1955_v10 }
 0x4d0   : > { %1846 = vmatprep.subr.bf16.mxu0 %v2062_v8 }
 0x54d   : > { %v642_v40 = vpop.f32.mrf.mxu0 }
 0x54e   : > { %648 = vst.msk [vmem:[#allocation2] sm:$0xff] %vm540_vm2, %v642_v40 }
 0x54f   : > { %v1784_v41 = vpop.f32.mrf.mxu0 }
 0x551   : > { %v645_v42 = vpop.f32.mrf.mxu0 }
 0x553   : > { %v1785_v43 = vpop.f32.mrf.mxu0 }
 0x55b   : > { %v753_v44 = vpop.f32.mrf.mxu0 }
 0x55c   : > { %760 = vrot.lane.b32.xlu0 %v753_v44, %s2075_s23  ;;  %s2077_s23 = smov 24  }
 0x55d   : > { %v1796_v45 = vpop.f32.mrf.mxu0 }
 0x55f   : > { %v756_v46 = vpop.f32.mrf.mxu0 }
 0x561   : > { %v1797_v47 = vpop.f32.mrf.mxu0 }
 0x582   : > { %v869_v50 = vpop.f32.mrf.mxu0 }
 0x583   : > { %876 = vrot.lane.b32.xlu1 %v869_v50, %s2076_s22 }
 0x584   : > { %v1808_v51 = vpop.f32.mrf.mxu0 }
 0x586   : > { %v872_v52 = vpop.f32.mrf.mxu0 }
 0x588   : > { %v1809_v53 = vpop.f32.mrf.mxu0 }
 0x58a   : > { %v985_v54 = vpop.f32.mrf.mxu0 }
 0x58b   : > { %992 = vrot.lane.b32.xlu0 %v985_v54, %s2077_s23  ;;  %s429_s23 = sand.u32 1, %s2052_s26  }
 0x58c   : > { %v1820_v55 = vpop.f32.mrf.mxu0  ;;  %s1670_s24 = sshll.u32 %s429_s23, 3  ;;  %s1594_s30 = scalar_lea.sflag [#allocation4], %s429_s23 }
 0x58d   : > { %s431_s21 = scalar_lea.vmem [#allocation3], %s1670_s24 }
 0x58e   : > { %v988_v56 = vpop.f32.mrf.mxu0 }
 0x590   : > { %v1821_v57 = vpop.f32.mrf.mxu0 }
 0x5ce   : > { %v761_v58 = vpop.permute.xlu0 %760 }
 0x5cf   : > { %764 = vst.msk [vmem:[#allocation2] sm:$0xff] %vm763_vm4, %v761_v58 }
 0x5f5   : > { %v877_v59 = vpop.permute.xlu1 %876 }
 0x5f6   : > { %880 = vst.msk [vmem:[#allocation2] sm:$0xff] %vm879_vm5, %v877_v59 }
 0x5fd   : > { %v993_v60 = vpop.permute.xlu0 %992 }
 0x5fe   : > { %996 = vst.msk [vmem:[#allocation2] sm:$0xff] %vm995_vm6, %v993_v60 }
 0x605   : > { %v997_v61 = vld [vmem:[#allocation2] sm:$0xff] }
 0x606   : > { %v998_v62 = vpack.c.bf16 %v997_v61, %v997_v61  ;;  %v1960_v61 = vld [vmem:[%s2462_s11 + $0x28] sm:$0xff]  }
 0x608   : > { %1827 = vmatmul.mubr.msk.bf16.vlgmr.msra.gmra.mxu1 %vm440_vm0, %v998_v62  ;;  %v1961_v62 = vld [vmem:[%s2462_s11 + $0x20] sm:$0xff]  }
 0x609   : > { %1842 = vmatprep.mubr.msk.bf16.mxu1 %vm2063_vm1, %v2062_v8 }
 0x6c8   : > { %v1059_v1 = vpop.f32.mrf.mxu1 }
 0x6c9   : > { %v1060_v2 = vadd.f32 %v1686_v63, %v1059_v1 }
 0x6ca   : > { %v1828_v3 = vpop.f32.mrf.mxu1 }
 0x6cb   : > { %v2315_v4 = vadd.f32 %v1060_v2, %v2203_v0 }
 0x6cc   : > { %v1062_v5 = vpop.f32.mrf.mxu1 }
 0x6cd   : > { %v1068_v6 = vsel %vm440_vm0, %v2315_v4, 0.0 }
 0x6ce   : > { %1069 = vadd.xlane.f32.xlu1 %v1068_v6  ;;  %v1829_v7 = vpop.f32.mrf.mxu1 }
 0x6df   : > { %1175 = vrot.lane.b32.xlu1 %v1955_v10, %s2065_s20 }
 0x6e3   : > { %1181 = vrot.lane.b32.xlu1 %v1692_v15, %s2065_s20 }
 0x6e7   : > { %1347 = vrot.lane.b32.xlu1 %v1955_v10, %s2071_s15 }
 0x6eb   : > { %1465 = vrot.lane.b32.xlu1 %v1955_v10, %s2078_s16 }
 0x6ef   : > { %1471 = vrot.lane.b32.xlu1 %v1692_v15, %s2078_s16 }
 0x757   : > { %v1070_v0 = vpop.xlane.xlu1 %1069 }
 0x758   : > { %v1071_v11 = vmul.f32 0.03125, %v1070_v0 }
 0x75a   : > { %v1072_v12 = vsub.f32 %v2315_v4, %v1071_v11 }
 0x75b   : > { %v1176_v20 = vpop.permute.xlu1 %1175 }
 0x75c   : > { %v1073_v13 = vmul.f32 %v1072_v12, %v1072_v12 }
 0x75e   : > { %v1074_v14 = vsel %vm440_vm0, %v1073_v13, 0.0 }
 0x75f   : > { %1075 = vadd.xlane.f32.xlu0 %v1074_v14  ;;  %v1182_v32 = vpop.permute.xlu1 %1181 }
 0x763   : > { %v1348_v58 = vpop.permute.xlu1 %1347 }
 0x767   : > { %v1466_v60 = vpop.permute.xlu1 %1465 }
 0x775   : > { %1177 = vrot.lane.b32.xlu0 %v1954_v9, %s2065_s20  ;;  %s1717_s20 = sshll.u32 %s2171_s29, 7  ;;  %s2079_s29 = smov [#allocation3]  }
 0x776   : > { %s2415_s1 = scalar_lea.hbm %s2464_s13, %s1717_s20  ;;  %s2004_s24 = sshll.u32 %s2079_s29, 4  ;;  %s2005_s24 = int_to_ptr.vmem [resolvable:$false] %s2004_s24 }
 0x777   : > { %s2006_s2 = scalar_lea.vmem %s2005_s24, 256 }
 0x779   : > { %1349 = vrot.lane.b32.xlu0 %v1954_v9, %s2071_s15 }
 0x77d   : > { %1467 = vrot.lane.b32.xlu0 %v1954_v9, %s2078_s16 }
 0x781   : > { %1353 = vrot.lane.b32.xlu0 %v1692_v15, %s2071_s15  ;;  %s1607_s15 = sshll.u32 %s431_s21, 4  ;;  %s1608_s15 = int_to_ptr.vmem [resolvable:$true] %s1607_s15 }
 0x782   : > { %s2000_s16 = scalar_lea.vmem %s1608_s15, 128  ;;  %p2007_p0 = scmp.lt.s32.totalorder %s1608_s15, %s2005_s24 }
 0x783   : > { %p2001_p11 = scmp.ne.s32.totalorder %s1608_s15, %s2000_s16  ;;  %p2008_p1 = scmp.lt.s32.totalorder %s2006_s2, %s2000_s16 }
 0x785   : > { %p2002_p12 = pnand %p2001_p11, %p2188_p5  ;;  %p2009_p2 = por %p2008_p1, %p2007_p0 }
 0x787   : > { %p2003_p13 = pneg %p2002_p12 }
 0x789   : > { %p2010_p3 = pnand %p2009_p2, %p2003_p13 }
 0x7e8   : > { %v1076_v16 = vpop.xlane.xlu0 %1075 }
 0x7e9   : > { %v1077_v17 = vmul.f32 0.03125, %v1076_v16 }
 0x7eb   : > { %v1078_v18 = vadd.f32 1e-05, %v1077_v17 }
 0x7ec   : > { %v1178_v19 = vpop.permute.xlu0 %1177 }
 0x7ed   : > { %1982 = vrsqrt.f32 %v1078_v18  ;;  %1839 = vmatpush3.bf16.msra.mxu1 %v1178_v19  ;;  %v1472_v18 = vpop.permute.xlu1 %1471 }
 0x7ee   : > { %1840 = vmatprep.subr.bf16.mxu1 %v2062_v8 }
 0x7f0   : > { %v1350_v57 = vpop.permute.xlu0 %1349 }
 0x7f1   : > { %1841 = vmatpush3.bf16.msra.mxu1 %v1176_v20 }
 0x7f2   : > { %1854 = vmatprep.subr.bf16.mxu1 %v2062_v8 }
 0x7f4   : > { %v1468_v59 = vpop.permute.xlu0 %1467 }
 0x7f8   : > { %v1354_v0 = vpop.permute.xlu0 %1353 }
 0x7fa   : > { %v1983_v21 = vpop.eup %1982 }
 0x7fb   : > { %v1080_v23 = vmul.f32 %v1983_v21, %v1072_v12 }
 0x7fd   : > { %v1087_v25 = vmul.f32 %v1690_v22, %v1080_v23 }
 0x7ff   : > { %v1094_v26 = vadd.f32 %v1691_v24, %v1087_v25 }
 0x801   : > { %v2346_v27 = vpack.c.bf16 %v1094_v26, %v1094_v26 }
 0x803   : > { %1835 = vmatmul.mubr.msk.bf16.vlgmr.msra.gmra.mxu0 %vm440_vm0, %v2346_v27  ;;  %1843 = vmatmul.mubr.msk.bf16.vlgmr.msra.gmra.mxu1 %vm440_vm0, %v2346_v27 }
 0x804   : > { %1850 = vmatprep.mubr.msk.bf16.mxu0 %vm2063_vm1, %v2062_v8  ;;  %1858 = vmatprep.mubr.msk.bf16.mxu1 %vm2063_vm1, %v2062_v8 }
 0x805   : > { %1847 = vmatpush3.bf16.msra.mxu0 %v1956_v28  ;;  %1855 = vmatpush3.bf16.msra.mxu1 %v1957_v29 }
 0x806   : > { %1848 = vmatprep.subr.bf16.mxu0 %v2062_v8  ;;  %1856 = vmatprep.subr.bf16.mxu1 %v2062_v8 }
 0x809   : > { %1849 = vmatpush3.bf16.msra.mxu0 %v1958_v30  ;;  %1857 = vmatpush3.bf16.msra.mxu1 %v1959_v31 }
 0x80a   : > { %1862 = vmatprep.subr.bf16.mxu0 %v2062_v8  ;;  %1870 = vmatprep.subr.bf16.mxu1 %v2062_v8 }
 0x8c3   : > { %v1156_v33 = vpop.f32.mrf.mxu0  ;;  %v1218_v34 = vpop.f32.mrf.mxu1 }
 0x8c4   : > { %v1157_v35 = vadd.f32 %v1692_v15, %v1156_v33  ;;  %v1219_v36 = vadd.f32 %v1218_v34, %v1182_v32  ;;  %v1962_v32 = vld [vmem:[%s2462_s11 + $0x38] sm:$0xff]   ;;  %v1963_v34 = vld [vmem:[%s2462_s11 + $0x30] sm:$0xff]  }
 0x8c5   : > { %v1836_v37 = vpop.f32.mrf.mxu0  ;;  %v1844_v38 = vpop.f32.mrf.mxu1 }
 0x8c6   : > { %v1696_v39 = vmul.f32 -1.702, %v1157_v35  ;;  %v1698_v40 = vmul.f32 -1.702, %v1219_v36 }
 0x8c7   : > { %v1159_v41 = vpop.f32.mrf.mxu0  ;;  %v1221_v42 = vpop.f32.mrf.mxu1 }
 0x8c8   : > { %v1164_v43 = vmul.f32 1.442695, %v1696_v39  ;;  %v1226_v44 = vmul.f32 1.442695, %v1698_v40 }
 0x8c9   : > { %v1837_v45 = vpop.f32.mrf.mxu0  ;;  %v1845_v46 = vpop.f32.mrf.mxu1 }
 0x8ca   : > { %1984 = vpow2.f32 %v1164_v43 }
 0x8cb   : > { %1986 = vpow2.f32 %v1226_v44  ;;  %v1715_v44 = vld [vmem:[%s2463_s12] ss:$0 sm:$0xff] }
 0x8d7   : > { %v1985_v47 = vpop.eup %1984 }
 0x8d8   : > { %v1987_v48 = vpop.eup %1986  ;;  %v1166_v49 = vadd.f32 1.0, %v1985_v47 }
 0x8d9   : > { %v1228_v50 = vadd.f32 1.0, %v1987_v48 }
 0x8da   : > { %1988 = vrcp.f32 %v1166_v49 }
 0x8db   : > { %1990 = vrcp.f32 %v1228_v50 }
 0x8e7   : > { %v1989_v51 = vpop.eup %1988 }
 0x8e8   : > { %v1991_v52 = vpop.eup %1990  ;;  %v1169_v53 = vmul.f32 %v1989_v51, %v1157_v35 }
 0x8e9   : > { %v1231_v54 = vmul.f32 %v1991_v52, %v1219_v36 }
 0x8ea   : > { %v1170_v55 = vpack.c.bf16 %v1169_v53, %v1169_v53 }
 0x8eb   : > { %v1232_v56 = vpack.c.bf16 %v1231_v54, %v1231_v54 }
 0x8ec   : > { %1859 = vmatmul.mubr.msk.bf16.vlgmr.msra.gmra.mxu1 %vm440_vm0, %v1170_v55 }
 0x8ed   : > { %1851 = vmatmul.mubr.msk.bf16.vlgmr.msra.gmra.mxu0 %vm440_vm0, %v1232_v56  ;;  %1874 = vmatprep.mubr.msk.bf16.mxu1 %vm2063_vm1, %v2062_v8 }
 0x8ee   : > { %1863 = vmatpush3.bf16.msra.mxu0 %v1350_v57  ;;  %1866 = vmatprep.mubr.msk.bf16.mxu0 %vm2063_vm1, %v2062_v8 }
 0x8ef   : > { %1864 = vmatprep.subr.bf16.mxu0 %v2062_v8  ;;  %1871 = vmatpush3.bf16.msra.mxu1 %v1960_v61 }
 0x8f0   : > { %1872 = vmatprep.subr.bf16.mxu1 %v2062_v8 }
 0x8f2   : > { %1865 = vmatpush3.bf16.msra.mxu0 %v1348_v58 }
 0x8f3   : > { %1878 = vmatprep.subr.bf16.mxu0 %v2062_v8  ;;  %1873 = vmatpush3.bf16.msra.mxu1 %v1961_v62 }
 0x8f4   : > { %1886 = vmatprep.subr.bf16.mxu1 %v2062_v8 }
 0x8f5   : > { %1867 = vmatmul.mubr.msk.bf16.vlgmr.msra.gmra.mxu0 %vm440_vm0, %v2346_v27 }
 0x8f6   : > { %1879 = vmatpush3.bf16.msra.mxu0 %v1468_v59  ;;  %1882 = vmatprep.mubr.msk.bf16.mxu0 %vm2063_vm1, %v2062_v8 }
 0x8f7   : > { %1880 = vmatprep.subr.bf16.mxu0 %v2062_v8 }
 0x8fa   : > { %1881 = vmatpush3.bf16.msra.mxu0 %v1466_v60 }
 0x8fd   : > { %1883 = vmatmul.mubr.msk.bf16.vlgmr.msra.gmra.mxu0 %vm440_vm0, %v2346_v27 }
 0x9ac   : > { %v1341_v63 = vpop.f32.mrf.mxu1 }
 0x9ad   : > { %v1286_v1 = vpop.f32.mrf.mxu0 }
 0x9ae   : > { %v1342_v2 = vadd.f32 %v1341_v63, %v1286_v1  ;;  %v1860_v3 = vpop.f32.mrf.mxu1 }
 0x9af   : > { %v1852_v5 = vpop.f32.mrf.mxu0 }
 0x9b0   : > { %v1344_v6 = vpop.f32.mrf.mxu1 }
 0x9b1   : > { %v1289_v7 = vpop.f32.mrf.mxu0 }
 0x9b2   : > { %v1861_v9 = vpop.f32.mrf.mxu1 }
 0x9b3   : > { %v1853_v10 = vpop.f32.mrf.mxu0 }
 0x9b5   : > { %v1390_v11 = vpop.f32.mrf.mxu0 }
 0x9b6   : > { %v1391_v12 = vadd.f32 %v1390_v11, %v1354_v0 }
 0x9b7   : > { %v1868_v13 = vpop.f32.mrf.mxu0 }
 0x9b8   : > { %v1706_v14 = vmul.f32 -1.702, %v1391_v12 }
 0x9b9   : > { %v1393_v15 = vpop.f32.mrf.mxu0 }
 0x9ba   : > { %v1398_v16 = vmul.f32 1.442695, %v1706_v14 }
 0x9bb   : > { %v1869_v17 = vpop.f32.mrf.mxu0 }
 0x9bc   : > { %1992 = vpow2.f32 %v1398_v16 }
 0x9bd   : > { %v1508_v19 = vpop.f32.mrf.mxu0 }
 0x9be   : > { %v1509_v20 = vadd.f32 %v1508_v19, %v1472_v18 }
 0x9bf   : > { %v1884_v21 = vpop.f32.mrf.mxu0 }
 0x9c0   : > { %v1711_v22 = vmul.f32 -1.702, %v1509_v20 }
 0x9c1   : > { %v1511_v23 = vpop.f32.mrf.mxu0 }
 0x9c2   : > { %v1516_v24 = vmul.f32 1.442695, %v1711_v22 }
 0x9c3   : > { %v1885_v25 = vpop.f32.mrf.mxu0 }
 0x9c4   : > { %1994 = vpow2.f32 %v1516_v24 }
 0x9c9   : > { %v1993_v26 = vpop.eup %1992 }
 0x9ca   : > { %v1400_v27 = vadd.f32 1.0, %v1993_v26 }
 0x9cc   : > { %1996 = vrcp.f32 %v1400_v27 }
 0x9d1   : > { %v1995_v28 = vpop.eup %1994 }
 0x9d2   : > { %v1518_v29 = vadd.f32 1.0, %v1995_v28 }
 0x9d4   : > { %1998 = vrcp.f32 %v1518_v29 }
 0x9d9   : > { %v1997_v30 = vpop.eup %1996 }
 0x9da   : > { %v1403_v31 = vmul.f32 %v1997_v30, %v1391_v12 }
 0x9dc   : > { %v1404_v33 = vpack.c.bf16 %v1403_v31, %v1403_v31 }
 0x9de   : > { %1875 = vmatmul.mubr.msk.bf16.vlgmr.msra.gmra.mxu1 %vm440_vm0, %v1404_v33 }
 0x9df   : > { %1887 = vmatpush3.bf16.msra.mxu1 %v1962_v32  ;;  %1890 = vmatprep.mubr.msk.bf16.mxu1 %vm2063_vm1, %v2062_v8 }
 0x9e0   : > { %1888 = vmatprep.subr.bf16.mxu1 %v2062_v8 }
 0x9e1   : > { %v1999_v35 = vpop.eup %1998 }
 0x9e2   : > { %v1521_v36 = vmul.f32 %v1999_v35, %v1509_v20 }
 0x9e3   : > { %1889 = vmatpush3.bf16.msra.mxu1 %v1963_v34 }
 0x9e4   : > { %v1522_v37 = vpack.c.bf16 %v1521_v36, %v1521_v36 }
 0x9e6   : > { %1891 = vmatmul.mubr.msk.bf16.vlgmr.msra.gmra.mxu1 %vm440_vm0, %v1522_v37 }
 0xa9e   : > { %v1458_v38 = vpop.f32.mrf.mxu1 }
 0xa9f   : > { %v1464_v42 = vadd.f32 %v1458_v38, %v1342_v2 }
 0xaa0   : > { %v1876_v39 = vpop.f32.mrf.mxu1 }
 0xaa2   : > { %v1461_v40 = vpop.f32.mrf.mxu1 }
 0xaa4   : > { %v1877_v41 = vpop.f32.mrf.mxu1 }
 0xaa6   : > { %v1576_v43 = vpop.f32.mrf.mxu1 }
 0xaa7   : > { %v1582_v8 = vadd.f32 %v1576_v43, %v1464_v42 }
 0xaa8   : > { %v1892_v45 = vpop.f32.mrf.mxu1 }
 0xaa9   : > { %v1590_v46 = vadd.f32 %v1715_v44, %v1582_v8 }
 0xaaa   : > { %v1579_v47 = vpop.f32.mrf.mxu1 }
 0xaab   : > { %v1591_v48 = vadd.f32 %v1590_v46, %v2315_v4 }
 0xaac   : > { %v1893_v49 = vpop.f32.mrf.mxu1 }
 0xaad   : > { %1592 = vst.msk [vmem:[%s431_s21] sm:$0xff] %vm440_vm0, %v1591_v48 }
 0xaae   : > { %2013 = shalt.err (!%p2010_p3)
}
 0xaaf   : > { %s2014_s0 = scalar_lea.hbm %s2415_s1, 128  ;;  %s2018_s21 = scalar_lea.hbm %s2464_s13, 256 }
 0xab0   : > { %p2015_p4 = scmp.ne.s32.totalorder %s2415_s1, %s2014_s0  ;;  %p2019_p9 = scmp.lt.s32.totalorder %s2415_s1, %s2464_s13 }
 0xab1   : > { %p2020_p10 = scmp.lt.s32.totalorder %s2018_s21, %s2014_s0 }
 0xab2   : > { %p2016_p7 = pnand %p2015_p4, %p2188_p5 }
 0xab3   : > { %p2021_p11 = por %p2020_p10, %p2019_p9 }
 0xab4   : > { %p2017_p8 = pneg %p2016_p7 }
 0xab6   : > { %p2022_p12 = pnand %p2021_p11, %p2017_p8 }
 0xab8   : > { %2025 = shalt.err (!%p2022_p12)
}
 0xab9   : > { %1894 = dma.vmem_to_hbm [thread:$0]  (%p2188_p5), %s1608_s15, 128, %s2415_s1, %s1594_s30  }
 0xaba PF: > { %p1900_p13 = scmp.ge.s32.totalorder %s2060_s28, 2  ;;  %s1619_s2 = sand.u32 1, %s2048_s25  }
 0xabb   : > { %s1620_s16 = scalar_lea.sflag [#allocation4], %s1619_s2 }
 0xabc   : > { %p1897_p0 = pnand %p1900_p13, %p2192_p6 }
 0xabe   : > { %p1898_p1 = pneg %p1897_p0 }
 0xac0   : > { %2043 = dma.done.wait (%p1898_p1), %s1620_s16, 128  }
 0xac1   : > { %2045 = vsyncadd (%p1898_p1), %s1620_s16, 4294967168  ;;  %p23_p2 = scmp.ge.s32.totalorder %s2175_s14, 4   ;;  %s2473_s25 = smov %s2052_s26 }
 0xac2   : > { %s2474_s26 = smov %s2056_s27  ;;  %s2475_s27 = smov %s2186_s17 }
 0xac3   : > { %s2476_s28 = smov %s2175_s14  ;;  %25 = sbr.rel (!%p23_p2) target bundleno = 7 (0x7), region = 107 }
 0xac8   :  { %1625 = vsyncpa [#allocation4], 1 }
 0xac9   :  { %1627 = vsyncpa [#allocation4 + $0x1], 1 }

</bundles_post_ra>
